<compile_context>
chip_gen: v7x
topology: tpu7x:2x2x1
jax: 0.10.0
libtpu: 0.0.40
codegen_flags: <defaults>
</compile_context>

<pallas_src>
import functools

import jax
import jax.numpy as jnp
import numpy as np
from jax import lax
from jax.experimental import pallas as pl
from jax.experimental.pallas import tpu as pltpu


def _round_up(x, m):
    return ((x + m - 1) // m) * m


def _cdiv(a, b):
    return (a + b - 1) // b


def _coral_diff_gram_kernel(fs_ref, ft_ref, out_ref,
                            gdiff_ref, ssum_ref, tsum_ref,
                            *, b_true, n_col_tiles, tn, precision):
    """One (column-tile j, batch-tile i) step of the fused CORAL loss reduction."""
    j = pl.program_id(0)
    i = pl.program_id(1)
    dims = (((0,), (0,)), ((), ()))

    @pl.when(i == 0)
    def _init():
        gdiff_ref[...] = jnp.zeros_like(gdiff_ref)
        ssum_ref[...] = jnp.zeros_like(ssum_ref)
        tsum_ref[...] = jnp.zeros_like(tsum_ref)

    fs = fs_ref[...]                              # (TB, Dpp), native dtype
    ft = ft_ref[...]
    if n_col_tiles == 1:
        fs_c, ft_c = fs, ft                       # static full-width "column tile"
    else:
        col = pl.multiple_of(j * tn, 128)         # aligned lane slice of resident tile
        fs_c = fs_ref[:, pl.ds(col, tn)]
        ft_c = ft_ref[:, pl.ds(col, tn)]

    # Uncentered Gram difference for this column tile: fs^T fs_c - ft^T ft_c.
    # (No concatenated/negated operand copies; single accumulator read-modify-write.)
    gdiff_ref[...] += (
        lax.dot_general(fs, fs_c, dims,
                        preferred_element_type=jnp.float32, precision=precision)
        - lax.dot_general(ft, ft_c, dims,
                          preferred_element_type=jnp.float32, precision=precision))

    # Running column sums, accumulated directly in f32 (no full-tile astype temp).
    ssum_ref[...] += jnp.sum(fs, axis=0, dtype=jnp.float32, keepdims=True)
    tsum_ref[...] += jnp.sum(ft, axis=0, dtype=jnp.float32, keepdims=True)

    @pl.when(i == pl.num_programs(1) - 1)
    def _finalize():
        inv_b = jnp.float32(1.0 / b_true)
        ss = ssum_ref[...]                        # (1, Dpp)
        st = tsum_ref[...]
        if n_col_tiles == 1:
            ss_c, st_c = ss, st
        else:
            col = pl.multiple_of(j * tn, 128)
            ss_c = ssum_ref[:, pl.ds(col, tn)]
            st_c = tsum_ref[:, pl.ds(col, tn)]
        # Rank-2 mean correction subtracted IN PLACE (no second (Dpp, TN) live temp).
        gdiff_ref[...] -= (
            lax.dot_general(ss, ss_c, dims,
                            preferred_element_type=jnp.float32, precision=precision)
            - lax.dot_general(st, st_c, dims,
                              preferred_element_type=jnp.float32, precision=precision)
        ) * inv_b
        g = gdiff_ref[...]
        # Per-column-tile partial Frobenius sum; the 1/(b-1)^2 and 1/(4 d^2) scalar
        # scalings are deferred to the wrapper.
        out_ref[...] = jnp.zeros_like(out_ref) + jnp.sum(g * g)


def base_da_loss_forward(y_s, y_pred_s, y_pred_t,
                         domain_pred_s, domain_pred_t,
                         features_s, features_t, *, cast_to_bf16=False):
    # TODO(synk): BaseDALoss.forward is abstract (`pass`); this wrapper realizes the
    # representative CORAL-style DA loss over features_s/features_t used by concrete
    # subclasses.  y_s / y_pred_* / domain_pred_* are unused (base contract).
    if features_s.shape != features_t.shape:
        # TODO(synk): unequal source/target batch sizes would need separate divisors
        # and un-fused accumulators; not supported here.
        raise ValueError("features_s and features_t must share the same shape")
    B, D = features_s.shape
    if B < 2:
        raise ValueError("covariance requires batch size >= 2")

    fs_in, ft_in = features_s, features_t
    if cast_to_bf16 and fs_in.dtype == jnp.float32:
        # Optional MXU/HBM lever (bf16 MXU is the native fast path); off by default
        # to keep full f32 accuracy.
        fs_in = fs_in.astype(jnp.bfloat16)
        ft_in = ft_in.astype(jnp.bfloat16)
    itemsize = jnp.dtype(fs_in.dtype).itemsize
    # f32 inputs: force exact f32 contraction (default TPU matmul precision is bf16-ish).
    precision = lax.Precision.HIGHEST if fs_in.dtype == jnp.float32 else None

    # --- generation-aware VMEM plan (v5e/v6e: 128 MiB, v7x: 64 MiB physical) --------
    try:
        phys_vmem = int(pltpu.get_tpu_info().vmem_capacity_bytes)
    except Exception:
        phys_vmem = 64 << 20                       # conservative fallback (v7x per-core)
    vmem_limit = min(int(phys_vmem * 0.75), 100 << 20)   # ~96 MiB v5e/v6e, ~48 MiB v7x
    plan_budget = int(vmem_limit * 0.85)

    # --- column (lane) tiling --------------------------------------------------------
    Dp = _round_up(D, 128)
    # >= 2 column tiles for large D: feeds both v7x TensorCores via the "parallel" axis
    # and bounds accumulator + finalize temporaries instead of shrinking TB.
    n_col = 2 if Dp >= 1024 else 1
    while True:
        TN = _round_up(_cdiv(Dp, n_col), 128)
        # gdiff accumulator + finalize temporaries (~2x) + column-sum scratches.
        acc_bytes = 3 * Dp * TN * 4 + 2 * 8 * Dp * 4
        if TN == 128 or acc_bytes <= plan_budget // 2:
            break
        n_col += 1
    Dpp = n_col * TN

    # --- batch (sublane) tiling, padding-aware ---------------------------------------
    n_buf = 2                                     # double-buffered inputs
    # TODO(synk): for Dpp<=256/f32 (HBM-bound) pl.Buffered(3) on the input specs is a
    # minor additional win once TB is maximized; left at default pipeline depth here.
    per_row_bytes = 2 * n_buf * Dpp * itemsize
    avail = max(plan_budget - acc_bytes, 8 * per_row_bytes)
    tb_cap = 1024 if Dpp <= 256 else 512
    tb_max = max(8, min(tb_cap, (avail // per_row_bytes) // 8 * 8))
    n_bt = _cdiv(B, tb_max)
    TB = _round_up(_cdiv(B, n_bt), 8)             # minimizes zero-padded batch rows
    Bp = _round_up(B, TB)

    fs, ft = fs_in, ft_in
    if Bp != B or Dpp != D:
        # Zero padding is exact here: padded rows/cols contribute nothing to the Gram
        # or the mean correction, and the true (B, D) are used for all scaling.
        fs = jnp.pad(fs, ((0, Bp - B), (0, Dpp - D)))
        ft = jnp.pad(ft, ((0, Bp - B), (0, Dpp - D)))

    grid = (n_col, Bp // TB)

    kernel = functools.partial(_coral_diff_gram_kernel,
                               b_true=float(B), n_col_tiles=n_col, tn=TN,
                               precision=precision)

    cost = pl.CostEstimate(
        flops=4 * Bp * Dpp * Dpp + 4 * Dpp * Dpp,
        transcendentals=0,
        bytes_accessed=2 * n_col * Bp * Dpp * itemsize + n_col * 8 * 128 * 4,
    )

    partials = pl.pallas_call(
        kernel,
        grid=grid,
        out_shape=jax.ShapeDtypeStruct((n_col, 8, 128), jnp.float32),
        in_specs=[
            pl.BlockSpec((TB, Dpp), lambda j, i: (i, 0)),
            pl.BlockSpec((TB, Dpp), lambda j, i: (i, 0)),
        ],
        out_specs=pl.BlockSpec((1, 8, 128), lambda j, i: (j, 0, 0)),
        scratch_shapes=[
            pltpu.VMEM((Dpp, TN), jnp.float32),   # running Gram difference (column tile)
            pltpu.VMEM((1, Dpp), jnp.float32),    # running source column sum
            pltpu.VMEM((1, Dpp), jnp.float32),    # running target column sum
        ],
        compiler_params=pltpu.CompilerParams(
            dimension_semantics=("parallel", "arbitrary"),
            vmem_limit_bytes=vmem_limit),
        cost_estimate=cost,
    )(fs, ft)

    # Deferred scalar scaling: cov diff = corrected-Gram / (b-1); loss = ||.||_F^2/(4 d^2).
    frob = jnp.sum(partials[:, 0, 0])
    bf = jnp.float32(B)
    df = jnp.float32(D)
    return frob / ((bf - 1.0) * (bf - 1.0)) / (4.0 * df * df)


def _reference_loss_np(fs, ft):
    fs = np.asarray(fs, dtype=np.float64)
    ft = np.asarray(ft, dtype=np.float64)
    b, d = fs.shape
    cs = fs - fs.mean(axis=0, keepdims=True)
    ct = ft - ft.mean(axis=0, keepdims=True)
    cov_s = cs.T @ cs / (b - 1)
    cov_t = ct.T @ ct / (b - 1)
    return float(((cov_s - cov_t) ** 2).sum() / (4.0 * d * d))


if __name__ == "__main__":
    key = jax.random.PRNGKey(0)
    k1, k2, k3, k4, k5, k6 = jax.random.split(key, 6)

    B = 8          # batch (same for source and target)
    D = 32         # feature/hidden dim
    C = 4          # number of classes

    y_s           = jax.random.randint(k1, (B,), 0, C)
    y_pred_s      = jax.random.normal(k2, (B, C), dtype=jnp.float32)
    y_pred_t      = jax.random.normal(k3, (B, C), dtype=jnp.float32)
    domain_pred_s = jax.random.normal(k4, (B,), dtype=jnp.float32)
    domain_pred_t = jax.random.normal(k5, (B,), dtype=jnp.float32)
    features_s    = jax.random.normal(k6, (B, D), dtype=jnp.float32)
    features_t    = jax.random.normal(jax.random.fold_in(key, 7), (B, D),
                                      dtype=jnp.float32)

    loss = base_da_loss_forward(y_s, y_pred_s, y_pred_t,
                                domain_pred_s, domain_pred_t,
                                features_s, features_t)
    loss = jax.block_until_ready(loss)
    ref = _reference_loss_np(features_s, features_t)
    assert np.allclose(np.asarray(loss), ref, rtol=1e-4, atol=1e-8), (float(loss), ref)

    # Also exercise a shape that forces padding-aware batch tiling + lane padding.
    B2, D2 = 300, 96
    fs2 = jax.random.normal(jax.random.fold_in(key, 11), (B2, D2), jnp.float32)
    ft2 = jax.random.normal(jax.random.fold_in(key, 12), (B2, D2), jnp.float32)
    loss2 = jax.block_until_ready(
        base_da_loss_forward(None, None, None, None, None, fs2, ft2))
    ref2 = _reference_loss_np(fs2, ft2)
    assert np.allclose(np.asarray(loss2), ref2, rtol=1e-4, atol=1e-8), (float(loss2), ref2)

    print("KERNEL_OK")
</pallas_src>

<mosaic_0001>
module attributes {stable_mosaic.version = 11 : i64} {
  func.func @_coral_diff_gram_kernel(%arg0: i32, %arg1: i32, %arg2: memref<8x128xf32, #tpu.memory_space<vmem>>, %arg3: memref<8x128xf32, #tpu.memory_space<vmem>>, %arg4: memref<1x8x128xf32, #tpu.memory_space<vmem>>, %arg5: memref<128x128xf32, #tpu.memory_space<vmem>>, %arg6: memref<1x128xf32, #tpu.memory_space<vmem>>, %arg7: memref<1x128xf32, #tpu.memory_space<vmem>>) attributes {dimension_semantics = [#tpu.dimension_semantics<parallel>, #tpu.dimension_semantics<arbitrary>], iteration_bounds = array<i64: 1, 1>, scalar_prefetch = 0 : i64, scratch_operands = 3 : i64, tpu.core_type = #tpu.core_type<tc>, window_params = [{transform_indices = @transform_0, window_bounds = array<i64: 8, 128>}, {transform_indices = @transform_1, window_bounds = array<i64: 8, 128>}, {transform_indices = @transform_2, window_bounds = array<i64: 1, 8, 128>}]} {
    %c0_i32 = arith.constant 0 : i32
    %0 = arith.cmpi eq, %arg1, %c0_i32 : i32
    %1 = arith.extui %0 : i1 to i32
    %c0_i32_0 = arith.constant 0 : i32
    %2 = arith.cmpi ne, %1, %c0_i32_0 : i32
    scf.if %2 {
      %cst_21 = arith.constant 0.000000e+00 : f32
      %24 = vector.broadcast %cst_21 : f32 to vector<128x128xf32>
      %c0_22 = arith.constant 0 : index
      %c0_23 = arith.constant 0 : index
      %25 = vector.load %arg5[%c0_22, %c0_23] : memref<128x128xf32, #tpu.memory_space<vmem>>, vector<128x128xf32>
      tpu.vector_store %arg5[%c0_22, %c0_23], %24 {strides = array<i32>} : memref<128x128xf32, #tpu.memory_space<vmem>>, vector<128x128xf32>,
      %cst_24 = arith.constant 0.000000e+00 : f32
      %26 = vector.broadcast %cst_24 : f32 to vector<1x128xf32>
      %c0_25 = arith.constant 0 : index
      %c0_26 = arith.constant 0 : index
      %27 = vector.load %arg6[%c0_25, %c0_26] : memref<1x128xf32, #tpu.memory_space<vmem>>, vector<1x128xf32>
      tpu.vector_store %arg6[%c0_25, %c0_26], %26 {strides = array<i32>} : memref<1x128xf32, #tpu.memory_space<vmem>>, vector<1x128xf32>,
      %cst_27 = arith.constant 0.000000e+00 : f32
      %28 = vector.broadcast %cst_27 : f32 to vector<1x128xf32>
      %c0_28 = arith.constant 0 : index
      %c0_29 = arith.constant 0 : index
      %29 = vector.load %arg7[%c0_28, %c0_29] : memref<1x128xf32, #tpu.memory_space<vmem>>, vector<1x128xf32>
      tpu.vector_store %arg7[%c0_28, %c0_29], %28 {strides = array<i32>} : memref<1x128xf32, #tpu.memory_space<vmem>>, vector<1x128xf32>,
    } else {
    }
    %c0 = arith.constant 0 : index
    %c0_1 = arith.constant 0 : index
    %3 = vector.load %arg2[%c0, %c0_1] : memref<8x128xf32, #tpu.memory_space<vmem>>, vector<8x128xf32>
    %c0_2 = arith.constant 0 : index
    %c0_3 = arith.constant 0 : index
    %4 = vector.load %arg3[%c0_2, %c0_3] : memref<8x128xf32, #tpu.memory_space<vmem>>, vector<8x128xf32>
    %c0_4 = arith.constant 0 : index
    %c0_5 = arith.constant 0 : index
    %5 = vector.load %arg5[%c0_4, %c0_5] : memref<128x128xf32, #tpu.memory_space<vmem>>, vector<128x128xf32>
    %cst = arith.constant dense<0.000000e+00> : vector<128x128xf32>
    %6 = tpu.matmul %3, %3, %cst {dimension_numbers = #tpu.dot_dimension_numbers<[0], [0], [1], [1], [0, 1, 1, 1], [], []>, precision = #tpu.contract_precision<fp32>} : vector<8x128xf32>, vector<8x128xf32>, vector<128x128xf32> -> vector<128x128xf32>
    %cst_6 = arith.constant dense<0.000000e+00> : vector<128x128xf32>
    %7 = tpu.matmul %4, %4, %cst_6 {dimension_numbers = #tpu.dot_dimension_numbers<[0], [0], [1], [1], [0, 1, 1, 1], [], []>, precision = #tpu.contract_precision<fp32>} : vector<8x128xf32>, vector<8x128xf32>, vector<128x128xf32> -> vector<128x128xf32>
    %8 = arith.subf %6, %7 : vector<128x128xf32>
    %9 = arith.addf %5, %8 : vector<128x128xf32>
    %c0_7 = arith.constant 0 : index
    %c0_8 = arith.constant 0 : index
    %10 = vector.load %arg5[%c0_7, %c0_8] : memref<128x128xf32, #tpu.memory_space<vmem>>, vector<128x128xf32>
    tpu.vector_store %arg5[%c0_7, %c0_8], %9 {strides = array<i32>} : memref<128x128xf32, #tpu.memory_space<vmem>>, vector<128x128xf32>,
    %c0_9 = arith.constant 0 : index
    %c0_10 = arith.constant 0 : index
    %11 = vector.load %arg6[%c0_9, %c0_10] : memref<1x128xf32, #tpu.memory_space<vmem>>, vector<1x128xf32>
    %cst_11 = arith.constant dense<0.000000e+00> : vector<128xf32>
    %12 = vector.multi_reduction <add>, %3, %cst_11 [0] : vector<8x128xf32> to vector<128xf32>
    %13 = vector.shape_cast %12 : vector<128xf32> to vector<1x128xf32>
    %14 = arith.addf %11, %13 : vector<1x128xf32>
    %c0_12 = arith.constant 0 : index
    %c0_13 = arith.constant 0 : index
    %15 = vector.load %arg6[%c0_12, %c0_13] : memref<1x128xf32, #tpu.memory_space<vmem>>, vector<1x128xf32>
    tpu.vector_store %arg6[%c0_12, %c0_13], %14 {strides = array<i32>} : memref<1x128xf32, #tpu.memory_space<vmem>>, vector<1x128xf32>,
    %c0_14 = arith.constant 0 : index
    %c0_15 = arith.constant 0 : index
    %16 = vector.load %arg7[%c0_14, %c0_15] : memref<1x128xf32, #tpu.memory_space<vmem>>, vector<1x128xf32>
    %cst_16 = arith.constant dense<0.000000e+00> : vector<128xf32>
    %17 = vector.multi_reduction <add>, %4, %cst_16 [0] : vector<8x128xf32> to vector<128xf32>
    %18 = vector.shape_cast %17 : vector<128xf32> to vector<1x128xf32>
    %19 = arith.addf %16, %18 : vector<1x128xf32>
    %c0_17 = arith.constant 0 : index
    %c0_18 = arith.constant 0 : index
    %20 = vector.load %arg7[%c0_17, %c0_18] : memref<1x128xf32, #tpu.memory_space<vmem>>, vector<1x128xf32>
    tpu.vector_store %arg7[%c0_17, %c0_18], %19 {strides = array<i32>} : memref<1x128xf32, #tpu.memory_space<vmem>>, vector<1x128xf32>,
    %c0_i32_19 = arith.constant 0 : i32
    %21 = arith.cmpi eq, %arg1, %c0_i32_19 : i32
    %22 = arith.extui %21 : i1 to i32
    %c0_i32_20 = arith.constant 0 : i32
    %23 = arith.cmpi ne, %22, %c0_i32_20 : i32
    scf.if %23 {
      %c0_21 = arith.constant 0 : index
      %c0_22 = arith.constant 0 : index
      %24 = vector.load %arg6[%c0_21, %c0_22] : memref<1x128xf32, #tpu.memory_space<vmem>>, vector<1x128xf32>
      %c0_23 = arith.constant 0 : index
      %c0_24 = arith.constant 0 : index
      %25 = vector.load %arg7[%c0_23, %c0_24] : memref<1x128xf32, #tpu.memory_space<vmem>>, vector<1x128xf32>
      %c0_25 = arith.constant 0 : index
      %c0_26 = arith.constant 0 : index
      %26 = vector.load %arg5[%c0_25, %c0_26] : memref<128x128xf32, #tpu.memory_space<vmem>>, vector<128x128xf32>
      %cst_27 = arith.constant dense<0.000000e+00> : vector<128x128xf32>
      %27 = tpu.matmul %24, %24, %cst_27 {dimension_numbers = #tpu.dot_dimension_numbers<[0], [0], [1], [1], [0, 1, 1, 1], [], []>, precision = #tpu.contract_precision<fp32>} : vector<1x128xf32>, vector<1x128xf32>, vector<128x128xf32> -> vector<128x128xf32>
      %cst_28 = arith.constant dense<0.000000e+00> : vector<128x128xf32>
      %28 = tpu.matmul %25, %25, %cst_28 {dimension_numbers = #tpu.dot_dimension_numbers<[0], [0], [1], [1], [0, 1, 1, 1], [], []>, precision = #tpu.contract_precision<fp32>} : vector<1x128xf32>, vector<1x128xf32>, vector<128x128xf32> -> vector<128x128xf32>
      %29 = arith.subf %27, %28 : vector<128x128xf32>
      %cst_29 = arith.constant 1.250000e-01 : f32
      %30 = vector.broadcast %cst_29 : f32 to vector<128x128xf32>
      %31 = arith.mulf %29, %30 : vector<128x128xf32>
      %32 = arith.subf %26, %31 : vector<128x128xf32>
      %c0_30 = arith.constant 0 : index
      %c0_31 = arith.constant 0 : index
      %33 = vector.load %arg5[%c0_30, %c0_31] : memref<128x128xf32, #tpu.memory_space<vmem>>, vector<128x128xf32>
      tpu.vector_store %arg5[%c0_30, %c0_31], %32 {strides = array<i32>} : memref<128x128xf32, #tpu.memory_space<vmem>>, vector<128x128xf32>,
      %c0_32 = arith.constant 0 : index
      %c0_33 = arith.constant 0 : index
      %34 = vector.load %arg5[%c0_32, %c0_33] : memref<128x128xf32, #tpu.memory_space<vmem>>, vector<128x128xf32>
      %cst_34 = arith.constant 0.000000e+00 : f32
      %35 = vector.broadcast %cst_34 : f32 to vector<1x8x128xf32>
      %36 = arith.mulf %34, %34 : vector<128x128xf32>
      %37 = vector.shape_cast %36 : vector<128x128xf32> to vector<1x128x128xf32>
      %cst_35 = arith.constant dense<0.000000e+00> : vector<1xf32>
      %38 = vector.multi_reduction <add>, %37, %cst_35 [1, 2] : vector<1x128x128xf32> to vector<1xf32>
      %39 = vector.shape_cast %38 : vector<1xf32> to vector<1x1x1xf32>
      %40 = vector.extract %39[0, 0, 0] : f32 from vector<1x1x1xf32>
      %41 = vector.broadcast %40 : f32 to vector<1x8x128xf32>
      %42 = arith.addf %35, %41 : vector<1x8x128xf32>
      %c0_36 = arith.constant 0 : index
      %c0_37 = arith.constant 0 : index
      %c0_38 = arith.constant 0 : index
      %43 = vector.load %arg4[%c0_36, %c0_37, %c0_38] : memref<1x8x128xf32, #tpu.memory_space<vmem>>, vector<1x8x128xf32>
      tpu.vector_store %arg4[%c0_36, %c0_37, %c0_38], %42 {strides = array<i32>} : memref<1x8x128xf32, #tpu.memory_space<vmem>>, vector<1x8x128xf32>,
    } else {
    }
    return
  }
  func.func @transform_0(%arg0: i32, %arg1: i32) -> (i32, i32) {
    %c0_i32 = arith.constant 0 : i32
    %c0_i32_0 = arith.constant 0 : i32
    return %arg1, %c0_i32 : i32, i32
  }
  func.func @transform_1(%arg0: i32, %arg1: i32) -> (i32, i32) {
    %c0_i32 = arith.constant 0 : i32
    %c0_i32_0 = arith.constant 0 : i32
    return %arg1, %c0_i32 : i32, i32
  }
  func.func @transform_2(%arg0: i32, %arg1: i32) -> (i32, i32, i32) {
    %c0_i32 = arith.constant 0 : i32
    %c0_i32_0 = arith.constant 0 : i32
    %c0_i32_1 = arith.constant 0 : i32
    return %arg0, %c0_i32, %c0_i32_0 : i32, i32, i32
  }
}

</mosaic_0001>

<bundles_post_ra>
// kernel: tpu_custom_call.1
= control target key start
LH: loop header
LB: loop body
LE: loop exit
PB: predicated region body
PF: predicated region fallthrough
CT: control target
= control target key end

     0   :  { %7 = vsyncpa [#allocation6], 0  ;;  %s7834_s0 = inlined_call_operand.hbm [shape: f32[8,128], index: 0, kind: input, shape index: {}]   ;;  %s7835_s1 = inlined_call_operand.hbm [shape: f32[8,128], index: 1, kind: input, shape index: {}]   ;;  %s7836_s2 = inlined_call_operand.hbm [shape: f32[1,8,128], index: 2, kind: output, shape index: {}]  }
   0x1   :  { %8 = vsyncpa [#allocation9], 0 }
   0x2   :  { %9 = vsyncpa [#allocation7], 0  ;;  %s6425_s9 = smov [#allocation5]   ;;  %s6426_s11 = smov [#allocation8]  }
   0x3   :  { %s16_s10 = sshll.u32 %s6425_s9, 4  ;;  %s26_s12 = sshll.u32 %s6426_s11, 4  ;;  %s17_s10 = int_to_ptr.vmem [resolvable:$true] %s16_s10  ;;  %s27_s12 = int_to_ptr.vmem [resolvable:$true] %s26_s12 }
   0x4   :  { %s6353_s15 = scalar_lea.hbm %s7834_s0, 128 }
   0x5   :  { %p6354_p0 = scmp.ne.s32.totalorder %s7834_s0, %s6353_s15  ;;  %p6357_p1 = scmp.lt.u32.totalorder %s6353_s15, %s7834_s0 }
   0x7   :  { %p6359_p2 = pnand %p6357_p1, %p6354_p0 }
   0x9   :  { %6362 = shalt.err (!%p6359_p2)
}
   0xa   :  { %s6363_s20 = scalar_lea.vmem %s17_s10, 128  ;;  %p6368_p4 = scmp.lt.s32.totalorder %s17_s10, %s17_s10 }
   0xb   :  { %p6364_p3 = scmp.ne.s32.totalorder %s17_s10, %s6363_s20  ;;  %p6369_p5 = scmp.lt.s32.totalorder %s6363_s20, %s6363_s20 }
   0xd   :  { %p6370_p6 = por %p6369_p5, %p6368_p4 }
   0xf   :  { %p6371_p7 = pnand %p6370_p6, %p6364_p3 }
  0x11   :  { %6374 = shalt.err (!%p6371_p7)
}
  0x12   :  { %19 = dma.hbm_to_vmem [thread:$0]  %s7834_s0, 128, %s17_s10, [#allocation6]  }
  0x13   :  { %s6375_s25 = scalar_lea.hbm %s7835_s1, 128 }
  0x14   :  { %p6376_p8 = scmp.ne.s32.totalorder %s7835_s1, %s6375_s25  ;;  %p6379_p9 = scmp.lt.u32.totalorder %s6375_s25, %s7835_s1 }
  0x16   :  { %p6381_p10 = pnand %p6379_p9, %p6376_p8 }
  0x18   :  { %6384 = shalt.err (!%p6381_p10)
}
  0x19   :  { %s6385_s30 = scalar_lea.vmem %s27_s12, 128  ;;  %p6390_p12 = scmp.lt.s32.totalorder %s27_s12, %s27_s12 }
  0x1a   :  { %p6386_p11 = scmp.ne.s32.totalorder %s27_s12, %s6385_s30  ;;  %p6391_p13 = scmp.lt.s32.totalorder %s6385_s30, %s6385_s30 }
  0x1c   :  { %p6392_p0 = por %p6391_p13, %p6390_p12 }
  0x1e   :  { %p6393_p1 = pnand %p6392_p0, %p6386_p11 }
  0x20   :  { %6396 = shalt.err (!%p6393_p1)
}
  0x21   :  { %29 = dma.hbm_to_vmem [thread:$0]  %s7835_s1, 128, %s27_s12, [#allocation9]  }
  0x22   :  { %6419 = dma.done.wait [#allocation6], 128  }
  0x23   :  { %6420 = vsyncadd [#allocation6], 4294967168 }
  0x24   :  { %6421 = dma.done.wait [#allocation9], 128  }
  0x25   :  { %6422 = vsyncadd [#allocation9], 4294967168  ;;  %v6427_v0 = vmov 0.0   ;;  %v58_v1 = vld [vmem:[#allocation5] sm:$0xff]  ;;  %v59_v2 = vld [vmem:[#allocation8] sm:$0xff]  ;;  %vm108_vm0 = vcmask 64512  }
  0x26   :  { %56 = vst [vmem:[#allocation3] sm:$0x1] %v6427_v0  ;;  %57 = vst [vmem:[#allocation4] sm:$0x1] %v6427_v0  ;;  %76 = vxpose.xlu0.b32.start.end [1/1] (short) %v58_v1, 128  ;;  %v6468_v3 = vand.u32 4294901760, %v58_v1  ;;  %v2468_v4 = vrot.slane %v58_v1, 4 }
  0x27   :  { %v6470_v5 = vand.u32 4294901760, %v59_v2  ;;  %v2477_v6 = vrot.slane %v59_v2, 4  ;;  %vm2587_vm1 = vcmask 1040384   ;;  %vm2538_vm2 = vcmask 7168   ;;  %s6428_s1 = smov [#allocation10]  }
  0x28   :  { %v2469_v7 = vadd.f32 %v2468_v4, %v58_v1  ;;  %5403 = vmatprep.subr.mxu0 %v6468_v3  ;;  %v6480_v22 = vsub.f32 %v58_v1, %v6468_v3  ;;  %s4985_s4 = sshll.u32 %s6428_s1, 4  ;;  %s4986_s4 = int_to_ptr.vmem [resolvable:$true] %s4985_s4 }
  0x29   :  { %v2478_v8 = vadd.f32 %v2477_v6, %v59_v2  ;;  %5404 = vmatpush3.msra.mxu0 %v6468_v3  ;;  %5559 = vmatprep.subr.mxu1 %v6470_v5  ;;  %v6488_v26 = vsub.f32 %v59_v2, %v6470_v5  ;;  %s6397_s6 = scalar_lea.vmem %s4986_s4, 128  ;;  %p6402_p3 = scmp.lt.s32.totalorder %s4986_s4, %s4986_s4 }
  0x2a   :  { %v2470_v9 = vrot.slane %v2469_v7, 2  ;;  %5560 = vmatpush3.msra.mxu1 %v6470_v5  ;;  %v6483_v23 = vand.u32 4294901760, %v6480_v22  ;;  %p6398_p2 = scmp.ne.s32.totalorder %s4986_s4, %s6397_s6  ;;  %p6403_p4 = scmp.lt.s32.totalorder %s6397_s6, %s6397_s6 }
  0x2b   :  { %v2479_v10 = vrot.slane %v2478_v8, 2  ;;  %v6491_v27 = vand.u32 4294901760, %v6488_v26 }
  0x2c   :  { %v2471_v11 = vadd.f32 %v2470_v9, %v2469_v7  ;;  %v387_v24 = vsub.f32 %v6480_v22, %v6483_v23  ;;  %p6404_p5 = por %p6403_p4, %p6402_p3 }
  0x2d   :  { %v2480_v12 = vadd.f32 %v2479_v10, %v2478_v8  ;;  %v2467_v15 = vld [vmem:[#allocation3] sm:$0x1]  ;;  %v2476_v16 = vld [vmem:[#allocation4] sm:$0x1]  ;;  %v1558_v28 = vsub.f32 %v6488_v26, %v6491_v27 }
  0x2e   :  { %v2472_v13 = vrot.slane %v2471_v11, 1  ;;  %v388_v25 = vand.u32 4294901760, %v387_v24  ;;  %p6405_p6 = pnand %p6404_p5, %p6398_p2 }
  0x2f   :  { %v2481_v14 = vrot.slane %v2480_v12, 1  ;;  %v6495_v29 = vand.u32 4294901760, %v1558_v28 }
  0x30   :  { %v2473_v17 = vadd.f32 %v2472_v13, %v2471_v11  ;;  %5429 = vmatprep.subr.mxu0 %v388_v25 }
  0x31   :  { %v2482_v18 = vadd.f32 %v2481_v14, %v2480_v12  ;;  %5585 = vmatprep.subr.mxu1 %v6495_v29 }
  0x32   :  { %v2474_v19 = vadd.f32 %v2473_v17, %v2467_v15 }
  0x33   :  { %v2483_v20 = vadd.f32 %v2482_v18, %v2476_v16 }
  0x34   :  { %2475 = vst [vmem:[#allocation3] sm:$0x1] %v2474_v19 }
  0x35   :  { %2484 = vst [vmem:[#allocation4] sm:$0x1] %v2483_v20 }
  0x3b   :  { %v6476_v21 = vld [vmem:[#allocation3] sm:$0x1] }
  0x3c   :  { %2506 = vxpose.xlu1.b32.start.end [1/1] (short) %v6476_v21, 128  ;;  %v2489_v30 = vld [vmem:[#allocation4] sm:$0x1] }
  0x3d   :  { %v6502_v34 = vsel %vm2587_vm1, %v2489_v30, 0 }
  0x3e   :  { %7970 = vst [vmem:[#allocation14_spill] sm:$0xff] %v6502_v34 }
  0x63   :  { %1248 = vxpose.xlu0.b32.start.end [1/1] (short) %v59_v2, 128 }
  0x79   :  { %3682 = vxpose.xlu1.b32.start.end [1/1] (short) %v2489_v30, 128 }
  0xa6   :  { %v92_v31 = vpop.trf.xlu0 }
  0xa7   :  { %v110_v32 = vsel %vm108_vm0, %v92_v31, 0 }
  0xa8   :  { %v6499_v33 = vand.u32 4294901760, %v110_v32 }
  0xaa   :  { %v6505_v35 = vsub.f32 %v110_v32, %v6499_v33  ;;  %v93_v36 = vpop.trf.xlu0 }
  0xab   :  { %v113_v37 = vsel %vm108_vm0, %v93_v36, 0 }
  0xac   :  { %v6508_v38 = vand.u32 4294901760, %v113_v37  ;;  %v7858_v39 = vand.u32 4294901760, %v6505_v35 }
  0xae   :  { %v6512_v40 = vsub.f32 %v113_v37, %v6508_v38  ;;  %v94_v41 = vpop.trf.xlu0  ;;  %v226_v42 = vsub.f32 %v6505_v35, %v7858_v39 }
  0xaf   :  { %v116_v43 = vsel %vm108_vm0, %v94_v41, 0 }
  0xb0   :  { %v7857_v44 = vand.u32 4294901760, %v6512_v40  ;;  %v6519_v45 = vand.u32 4294901760, %v116_v43  ;;  %v227_v46 = vand.u32 4294901760, %v226_v42 }
  0xb2   :  { %v6522_v47 = vsub.f32 %v116_v43, %v6519_v45  ;;  %5405 = vmatprep.mubr.f32.mxu0 %v227_v46  ;;  %v95_v48 = vpop.trf.xlu0  ;;  %v236_v49 = vsub.f32 %v6512_v40, %v7857_v44 }
  0xb3   :  { %v119_v50 = vsel %vm108_vm0, %v95_v48, 0 }
  0xb4   :  { %v7855_v51 = vand.u32 4294901760, %v6522_v47  ;;  %v6529_v52 = vand.u32 4294901760, %v119_v50  ;;  %v237_v53 = vand.u32 4294901760, %v236_v49 }
  0xb6   :  { %v6532_v54 = vsub.f32 %v119_v50, %v6529_v52  ;;  %v96_v55 = vpop.trf.xlu0  ;;  %5406 = vmatmul.mubr.f32.vlgmr.msra.gmra.mrb[0].mxu0 %v237_v53  ;;  %v246_v56 = vsub.f32 %v6522_v47, %v7855_v51 }
  0xb7   :  { %v122_v57 = vsel %vm108_vm0, %v96_v55, 0  ;;  %5430 = vmatpush3.msra.mxu0 %v388_v25 }
  0xb8   :  { %v7854_v58 = vand.u32 4294901760, %v6532_v54  ;;  %v6539_v59 = vand.u32 4294901760, %v122_v57  ;;  %v247_v60 = vand.u32 4294901760, %v246_v56  ;;  %5455 = vmatprep.subr.mxu0 %v6480_v22 }
  0xba   :  { %v6543_v61 = vsub.f32 %v122_v57, %v6539_v59  ;;  %v97_v62 = vpop.trf.xlu0  ;;  %5408 = vmatprep.mubr.f32.mxu0 %v247_v60  ;;  %v256_v63 = vsub.f32 %v6532_v54, %v7854_v58 }
  0xbb   :  { %v125_v0 = vsel %vm108_vm0, %v97_v62, 0 }
  0xbc   :  { %v7852_v1 = vand.u32 4294901760, %v6543_v61  ;;  %v6550_v2 = vand.u32 4294901760, %v125_v0  ;;  %v257_v4 = vand.u32 4294901760, %v256_v63 }
  0xbe   :  { %v6553_v6 = vsub.f32 %v125_v0, %v6550_v2  ;;  %v98_v7 = vpop.trf.xlu0  ;;  %5409 = vmatmul.mubr.f32.gmra.mrb[2].mxu0 %v257_v4  ;;  %v266_v8 = vsub.f32 %v6543_v61, %v7852_v1 }
  0xbf   :  { %v128_v9 = vsel %vm108_vm0, %v98_v7, 0 }
  0xc0   :  { %v7851_v10 = vand.u32 4294901760, %v6553_v6  ;;  %v6560_v11 = vand.u32 4294901760, %v128_v9  ;;  %v267_v12 = vand.u32 4294901760, %v266_v8 }
  0xc2   :  { %v6563_v13 = vsub.f32 %v128_v9, %v6560_v11  ;;  %v99_v14 = vpop.trf.xlu0  ;;  %5411 = vmatprep.mubr.f32.mxu0 %v267_v12  ;;  %v276_v15 = vsub.f32 %v6553_v6, %v7851_v10 }
  0xc3   :  { %v131_v16 = vsel %vm108_vm0, %v99_v14, 0 }
  0xc4   :  { %v7849_v17 = vand.u32 4294901760, %v6563_v13  ;;  %v6570_v18 = vand.u32 4294901760, %v131_v16  ;;  %v277_v19 = vand.u32 4294901760, %v276_v15 }
  0xc6   :  { %v6573_v20 = vsub.f32 %v131_v16, %v6570_v18  ;;  %v100_v24 = vpop.trf.xlu0  ;;  %5412 = vmatmul.mubr.f32.gmra.mrb[4].mxu0 %v277_v19  ;;  %v286_v25 = vsub.f32 %v6563_v13, %v7849_v17 }
  0xc7   :  { %v134_v28 = vsel %vm108_vm0, %v100_v24, 0 }
  0xc8   :  { %v7847_v30 = vand.u32 4294901760, %v6573_v20  ;;  %v6580_v31 = vand.u32 4294901760, %v134_v28  ;;  %v287_v32 = vand.u32 4294901760, %v286_v25 }
  0xca   :  { %7971 = vst [vmem:[#allocation15_spill] sm:$0xff] %v6580_v31  ;;  %v6583_v36 = vsub.f32 %v134_v28, %v6580_v31  ;;  %v101_v37 = vpop.trf.xlu0  ;;  %5414 = vmatprep.mubr.f32.mxu0 %v287_v32  ;;  %v296_v41 = vsub.f32 %v6573_v20, %v7847_v30 }
  0xcb   :  { %v137_v42 = vsel %vm108_vm0, %v101_v37, 0 }
  0xcc   :  { %v7845_v43 = vand.u32 4294901760, %v6583_v36  ;;  %v6590_v46 = vand.u32 4294901760, %v137_v42  ;;  %v297_v48 = vand.u32 4294901760, %v296_v41 }
  0xce   :  { %7972 = vst [vmem:[#allocation16_spill] sm:$0xff] %v6590_v46  ;;  %v6593_v49 = vsub.f32 %v137_v42, %v6590_v46  ;;  %v102_v50 = vpop.trf.xlu0  ;;  %5415 = vmatmul.mubr.f32.gmra.mrb[6].mxu0 %v297_v48  ;;  %v306_v53 = vsub.f32 %v6583_v36, %v7845_v43 }
  0xcf   :  { %v140_v55 = vsel %vm108_vm0, %v102_v50, 0 }
  0xd0   :  { %v7843_v56 = vand.u32 4294901760, %v6593_v49  ;;  %v6600_v57 = vand.u32 4294901760, %v140_v55  ;;  %v307_v60 = vand.u32 4294901760, %v306_v53 }
  0xd2   :  { %7973 = vst [vmem:[#allocation17_spill] sm:$0xff] %v6600_v57  ;;  %v6603_v62 = vsub.f32 %v140_v55, %v6600_v57  ;;  %v103_v63 = vpop.trf.xlu0  ;;  %5417 = vmatprep.mubr.f32.mxu0 %v307_v60  ;;  %v316_v0 = vsub.f32 %v6593_v49, %v7843_v56 }
  0xd3   :  { %v143_v4 = vsel %vm108_vm0, %v103_v63, 0 }
  0xd4   :  { %v7841_v7 = vand.u32 4294901760, %v6603_v62  ;;  %v6610_v8 = vand.u32 4294901760, %v143_v4  ;;  %v317_v9 = vand.u32 4294901760, %v316_v0 }
  0xd6   :  { %7974 = vst [vmem:[#allocation18_spill] sm:$0xff] %v6610_v8  ;;  %v6613_v12 = vsub.f32 %v143_v4, %v6610_v8  ;;  %v104_v14 = vpop.trf.xlu0  ;;  %5418 = vmatmul.mubr.f32.gmra.mrb[8].mxu0 %v317_v9  ;;  %v326_v15 = vsub.f32 %v6603_v62, %v7841_v7 }
  0xd7   :  { %v146_v16 = vsel %vm108_vm0, %v104_v14, 0 }
  0xd8   :  { %v7839_v19 = vand.u32 4294901760, %v6613_v12  ;;  %v6620_v24 = vand.u32 4294901760, %v146_v16  ;;  %v327_v25 = vand.u32 4294901760, %v326_v15 }
  0xda   :  { %7975 = vst [vmem:[#allocation19_spill] sm:$0xff] %v6620_v24  ;;  %v6623_v28 = vsub.f32 %v146_v16, %v6620_v24  ;;  %v105_v32 = vpop.trf.xlu0  ;;  %5420 = vmatprep.mubr.f32.mxu0 %v327_v25  ;;  %v336_v37 = vsub.f32 %v6613_v12, %v7839_v19 }
  0xdb   :  { %v149_v41 = vsel %vm108_vm0, %v105_v32, 0 }
  0xdc   :  { %v7838_v42 = vand.u32 4294901760, %v6623_v28  ;;  %v6630_v48 = vand.u32 4294901760, %v149_v41  ;;  %v337_v50 = vand.u32 4294901760, %v336_v37 }
  0xde   :  { %7976 = vst [vmem:[#allocation20_spill] sm:$0xff] %v6630_v48  ;;  %v6633_v53 = vsub.f32 %v149_v41, %v6630_v48  ;;  %v106_v55 = vpop.trf.xlu0  ;;  %5421 = vmatmul.mubr.f32.gmra.mrb[10].mxu0 %v337_v50  ;;  %v346_v60 = vsub.f32 %v6623_v28, %v7838_v42 }
  0xdf   :  { %v152_v63 = vsel %vm108_vm0, %v106_v55, 0 }
  0xe0   :  { %v7837_v0 = vand.u32 4294901760, %v6633_v53  ;;  %v6640_v4 = vand.u32 4294901760, %v152_v63  ;;  %v347_v9 = vand.u32 4294901760, %v346_v60 }
  0xe2   :  { %7977 = vst [vmem:[#allocation21_spill] sm:$0xff] %v6640_v4  ;;  %v6643_v14 = vsub.f32 %v152_v63, %v6640_v4  ;;  %v107_v15 = vpop.trf.xlu0  ;;  %5423 = vmatprep.mubr.f32.mxu0 %v347_v9  ;;  %v356_v16 = vsub.f32 %v6633_v53, %v7837_v0 }
  0xe3   :  { %v155_v25 = vsel %vm108_vm0, %v107_v15, 0 }
  0xe4   :  { %v7840_v32 = vand.u32 4294901760, %v6643_v14  ;;  %v6650_v37 = vand.u32 4294901760, %v155_v25  ;;  %v357_v41 = vand.u32 4294901760, %v356_v16 }
  0xe6   :  { %7978 = vst [vmem:[#allocation22_spill] sm:$0xff] %v6650_v37  ;;  %v6653_v50 = vsub.f32 %v155_v25, %v6650_v37  ;;  %v1264_v55 = vpop.trf.xlu0  ;;  %5424 = vmatmul.mubr.f32.gmra.mrb[12].mxu0 %v357_v41  ;;  %v366_v60 = vsub.f32 %v6643_v14, %v7840_v32 }
  0xe7   :  { %v1281_v63 = vsel %vm108_vm0, %v1264_v55, 0 }
  0xe8   :  { %v7842_v9 = vand.u32 4294901760, %v6653_v50  ;;  %v6660_v0 = vand.u32 4294901760, %v1281_v63  ;;  %v367_v15 = vand.u32 4294901760, %v366_v60 }
  0xea   :  { %v6663_v42 = vsub.f32 %v1281_v63, %v6660_v0  ;;  %v1265_v16 = vpop.trf.xlu0  ;;  %5426 = vmatprep.mubr.f32.mxu0 %v367_v15  ;;  %v376_v25 = vsub.f32 %v6653_v50, %v7842_v9 }
  0xeb   :  { %v1284_v41 = vsel %vm108_vm0, %v1265_v16, 0 }
  0xec   :  { %v6669_v19 = vand.u32 4294901760, %v1284_v41  ;;  %v377_v32 = vand.u32 4294901760, %v376_v25  ;;  %v7844_v55 = vand.u32 4294901760, %v6663_v42 }
  0xee   :  { %v6673_v7 = vsub.f32 %v1284_v41, %v6669_v19  ;;  %v1266_v60 = vpop.trf.xlu0  ;;  %5427 = vmatmul.mubr.f32.gmra.mrb[14].mxu0 %v377_v32  ;;  %v1397_v63 = vsub.f32 %v6663_v42, %v7844_v55 }
  0xef   :  { %v1287_v15 = vsel %vm108_vm0, %v1266_v60, 0  ;;  %5431 = vmatprep.mubr.f32.mxu0 %v6499_v33 }
  0xf0   :  { %v7846_v16 = vand.u32 4294901760, %v6673_v7  ;;  %v6681_v9 = vand.u32 4294901760, %v1287_v15  ;;  %v1398_v25 = vand.u32 4294901760, %v1397_v63 }
  0xf2   :  { %v6684_v56 = vsub.f32 %v1287_v15, %v6681_v9  ;;  %5561 = vmatprep.mubr.f32.mxu1 %v1398_v25  ;;  %v1267_v41 = vpop.trf.xlu0  ;;  %5432 = vmatmul.mubr.f32.vlgmr.msra.gmra.mrb[0].mxu0 %v6508_v38  ;;  %v1407_v32 = vsub.f32 %v6673_v7, %v7846_v16 }
  0xf3   :  { %v1290_v60 = vsel %vm108_vm0, %v1267_v41, 0  ;;  %5434 = vmatprep.mubr.f32.mxu0 %v6519_v45  ;;  %5456 = vmatpush3.msra.mxu0 %v6480_v22 }
  0xf4   :  { %v7848_v55 = vand.u32 4294901760, %v6684_v56  ;;  %v6694_v63 = vand.u32 4294901760, %v1290_v60  ;;  %v1408_v15 = vand.u32 4294901760, %v1407_v32  ;;  %5481 = vmatprep.subr.mxu0 %v6468_v3 }
  0xf6   :  { %v6698_v25 = vsub.f32 %v1290_v60, %v6694_v63  ;;  %5562 = vmatmul.mubr.f32.vlgmr.msra.gmra.mrb[0].mxu1 %v1408_v15  ;;  %v1268_v43 = vpop.trf.xlu0  ;;  %5435 = vmatmul.mubr.f32.gmra.mrb[2].mxu0 %v6529_v52  ;;  %v1417_v41 = vsub.f32 %v6684_v56, %v7848_v55 }
  0xf7   :  { %v1293_v22 = vsel %vm108_vm0, %v1268_v43, 0  ;;  %5437 = vmatprep.mubr.f32.mxu0 %v6539_v59  ;;  %5586 = vmatpush3.msra.mxu1 %v6495_v29 }
  0xf8   :  { %v7850_v32 = vand.u32 4294901760, %v6698_v25  ;;  %v6708_v16 = vand.u32 4294901760, %v1293_v22  ;;  %v1418_v60 = vand.u32 4294901760, %v1417_v41  ;;  %5611 = vmatprep.subr.mxu1 %v6488_v26 }
  0xfa   :  { %v6712_v15 = vsub.f32 %v1293_v22, %v6708_v16  ;;  %5564 = vmatprep.mubr.f32.mxu1 %v1418_v60  ;;  %v1269_v30 = vpop.trf.xlu0  ;;  %5438 = vmatmul.mubr.f32.gmra.mrb[4].mxu0 %v6550_v2  ;;  %v1427_v43 = vsub.f32 %v6698_v25, %v7850_v32 }
  0xfb   :  { %v1296_v29 = vsel %vm108_vm0, %v1269_v30, 0  ;;  %5440 = vmatprep.mubr.f32.mxu0 %v6560_v11 }
  0xfc   :  { %v7853_v55 = vand.u32 4294901760, %v6712_v15  ;;  %v6721_v41 = vand.u32 4294901760, %v1296_v29  ;;  %v1428_v17 = vand.u32 4294901760, %v1427_v43 }
  0xfe   :  { %v6724_v22 = vsub.f32 %v1296_v29, %v6721_v41  ;;  %5565 = vmatmul.mubr.f32.gmra.mrb[2].mxu1 %v1428_v17  ;;  %v1270_v60 = vpop.trf.xlu0  ;;  %5441 = vmatmul.mubr.f32.gmra.mrb[6].mxu0 %v6570_v18  ;;  %v1437_v32 = vsub.f32 %v6712_v15, %v7853_v55 }
  0xff   :  { %v1299_v30 = vsel %vm108_vm0, %v1270_v60, 0  ;;  %5443 = vmatprep.mubr.f32.mxu0 %v6580_v31 }
 0x100   :  { %v7856_v10 = vand.u32 4294901760, %v6724_v22  ;;  %v6733_v1 = vand.u32 4294901760, %v1299_v30  ;;  %v1438_v43 = vand.u32 4294901760, %v1437_v32 }
 0x102   :  { %v6736_v29 = vsub.f32 %v1299_v30, %v6733_v1  ;;  %5567 = vmatprep.mubr.f32.mxu1 %v1438_v43  ;;  %v1271_v17 = vpop.trf.xlu0  ;;  %5444 = vmatmul.mubr.f32.gmra.mrb[8].mxu0 %v6590_v46  ;;  %v1447_v55 = vsub.f32 %v6724_v22, %v7856_v10 }
 0x103   :  { %v1302_v60 = vsel %vm108_vm0, %v1271_v17, 0  ;;  %5446 = vmatprep.mubr.f32.mxu0 %v6600_v57 }
 0x104   :  { %v7859_v58 = vand.u32 4294901760, %v6736_v29  ;;  %v6745_v51 = vand.u32 4294901760, %v1302_v60  ;;  %v1448_v32 = vand.u32 4294901760, %v1447_v55 }
 0x106   :  { %v6748_v30 = vsub.f32 %v1302_v60, %v6745_v51  ;;  %5568 = vmatmul.mubr.f32.gmra.mrb[4].mxu1 %v1448_v32  ;;  %v1272_v43 = vpop.trf.xlu0  ;;  %5447 = vmatmul.mubr.f32.gmra.mrb[10].mxu0 %v6610_v8  ;;  %v1457_v10 = vsub.f32 %v6736_v29, %v7859_v58 }
 0x107   :  { %v1305_v17 = vsel %vm108_vm0, %v1272_v43, 0  ;;  %5449 = vmatprep.mubr.f32.mxu0 %v6620_v24 }
 0x108   :  { %v7863_v44 = vand.u32 4294901760, %v6748_v30  ;;  %v6757_v39 = vand.u32 4294901760, %v1305_v17  ;;  %v1458_v55 = vand.u32 4294901760, %v1457_v10 }
 0x10a   :  { %v6760_v60 = vsub.f32 %v1305_v17, %v6757_v39  ;;  %5570 = vmatprep.mubr.f32.mxu1 %v1458_v55  ;;  %v1273_v32 = vpop.trf.xlu0  ;;  %5450 = vmatmul.mubr.f32.gmra.mrb[12].mxu0 %v6630_v48  ;;  %v1467_v58 = vsub.f32 %v6748_v30, %v7863_v44 }
 0x10b   :  { %v1308_v43 = vsel %vm108_vm0, %v1273_v32, 0  ;;  %5452 = vmatprep.mubr.f32.mxu0 %v6640_v4 }
 0x10c   :  { %7979 = vst [vmem:[#allocation23_spill] sm:$0xff] %v6760_v60  ;;  %v7868_v34 = vand.u32 4294901760, %v6760_v60  ;;  %v6769_v24 = vand.u32 4294901760, %v1308_v43  ;;  %v1468_v10 = vand.u32 4294901760, %v1467_v58 }
 0x10e   :  { %v6772_v17 = vsub.f32 %v1308_v43, %v6769_v24  ;;  %5571 = vmatmul.mubr.f32.gmra.mrb[6].mxu1 %v1468_v10  ;;  %v1274_v55 = vpop.trf.xlu0  ;;  %5453 = vmatmul.mubr.f32.gmra.mrb[14].mxu0 %v6650_v37  ;;  %v1477_v44 = vsub.f32 %v6760_v60, %v7868_v34  ;;  %v6821_v60 = vpop.trf.xlu1 }
 0x10f   :  { %v1311_v32 = vsel %vm108_vm0, %v1274_v55, 0  ;;  %5457 = vmatprep.mubr.f32.mxu0 %v6505_v35  ;;  %7988 = vst [vmem:[#allocation32_spill] sm:$0xff] %v6821_v60 }
 0x110   :  { %7980 = vst [vmem:[#allocation24_spill] sm:$0xff] %v6772_v17  ;;  %v7873_v4 = vand.u32 4294901760, %v6772_v17  ;;  %v6781_v48 = vand.u32 4294901760, %v1311_v32  ;;  %v1478_v58 = vand.u32 4294901760, %v1477_v44 }
 0x112   :  { %7981 = vst [vmem:[#allocation25_spill] sm:$0xff] %v6781_v48  ;;  %v6784_v43 = vsub.f32 %v1311_v32, %v6781_v48  ;;  %5573 = vmatprep.mubr.f32.mxu1 %v1478_v58  ;;  %v1275_v10 = vpop.trf.xlu0  ;;  %5458 = vmatmul.mubr.f32.vlgmr.msra.gmra.mrb[0].mxu0 %v6512_v40  ;;  %v1487_v34 = vsub.f32 %v6772_v17, %v7873_v4 }
 0x113   :  { %v1314_v55 = vsel %vm108_vm0, %v1275_v10, 0  ;;  %5460 = vmatprep.mubr.f32.mxu0 %v6522_v47  ;;  %5482 = vmatpush3.msra.mxu0 %v6468_v3 }
 0x114   :  { %7982 = vst [vmem:[#allocation26_spill] sm:$0xff] %v6784_v43  ;;  %v7878_v37 = vand.u32 4294901760, %v6784_v43  ;;  %v6794_v44 = vand.u32 4294901760, %v1314_v55  ;;  %v1488_v32 = vand.u32 4294901760, %v1487_v34  ;;  %5507 = vmatprep.subr.mxu0 %v6483_v23 }
 0x116   :  { %7983 = vst [vmem:[#allocation27_spill] sm:$0xff] %v6794_v44  ;;  %v6798_v58 = vsub.f32 %v1314_v55, %v6794_v44  ;;  %5574 = vmatmul.mubr.f32.gmra.mrb[8].mxu1 %v1488_v32  ;;  %v1276_v8 = vpop.trf.xlu0  ;;  %5461 = vmatmul.mubr.f32.gmra.mrb[2].mxu0 %v6532_v54  ;;  %v1497_v10 = vsub.f32 %v6784_v43, %v7878_v37 }
 0x117   :  { %v1317_v4 = vsel %vm108_vm0, %v1276_v8, 0  ;;  %5463 = vmatprep.mubr.f32.mxu0 %v6543_v61 }
 0x118   :  { %7984 = vst [vmem:[#allocation28_spill] sm:$0xff] %v6798_v58  ;;  %v7885_v57 = vand.u32 4294901760, %v6798_v58  ;;  %v6807_v34 = vand.u32 4294901760, %v1317_v4  ;;  %v1498_v17 = vand.u32 4294901760, %v1497_v10 }
 0x11a   :  { %7985 = vst [vmem:[#allocation29_spill] sm:$0xff] %v6807_v34  ;;  %v6810_v55 = vsub.f32 %v1317_v4, %v6807_v34  ;;  %5576 = vmatprep.mubr.f32.mxu1 %v1498_v17  ;;  %v1277_v32 = vpop.trf.xlu0  ;;  %5464 = vmatmul.mubr.f32.gmra.mrb[4].mxu0 %v6553_v6  ;;  %v1507_v37 = vsub.f32 %v6798_v58, %v7885_v57 }
 0x11b   :  { %v1320_v8 = vsel %vm108_vm0, %v1277_v32, 0  ;;  %5466 = vmatprep.mubr.f32.mxu0 %v6563_v13 }
 0x11c   :  { %7986 = vst [vmem:[#allocation30_spill] sm:$0xff] %v6810_v55  ;;  %v7888_v43 = vand.u32 4294901760, %v6810_v55  ;;  %v6819_v46 = vand.u32 4294901760, %v1320_v8  ;;  %v1508_v10 = vand.u32 4294901760, %v1507_v37 }
 0x11e   :  { %7987 = vst [vmem:[#allocation31_spill] sm:$0xff] %v6819_v46  ;;  %v6824_v4 = vsub.f32 %v1320_v8, %v6819_v46  ;;  %5577 = vmatmul.mubr.f32.gmra.mrb[10].mxu1 %v1508_v10  ;;  %v1278_v17 = vpop.trf.xlu0  ;;  %5467 = vmatmul.mubr.f32.gmra.mrb[6].mxu0 %v6573_v20  ;;  %v1517_v32 = vsub.f32 %v6810_v55, %v7888_v43  ;;  %v6842_v55 = vpop.trf.xlu1 }
 0x11f   :  { %v1323_v57 = vsel %vm108_vm0, %v1278_v17, 0  ;;  %5469 = vmatprep.mubr.f32.mxu0 %v6583_v36  ;;  %7991 = vst [vmem:[#allocation35_spill] sm:$0xff] %v6842_v55 }
 0x120   :  { %7989 = vst [vmem:[#allocation33_spill] sm:$0xff] %v6824_v4  ;;  %v7893_v58 = vand.u32 4294901760, %v6824_v4  ;;  %v6833_v37 = vand.u32 4294901760, %v1323_v57  ;;  %v1518_v60 = vand.u32 4294901760, %v1517_v32 }
 0x122   :  { %7990 = vst [vmem:[#allocation34_spill] sm:$0xff] %v6833_v37  ;;  %v6836_v8 = vsub.f32 %v1323_v57, %v6833_v37  ;;  %5579 = vmatprep.mubr.f32.mxu1 %v1518_v60  ;;  %v1279_v10 = vpop.trf.xlu0  ;;  %5470 = vmatmul.mubr.f32.gmra.mrb[8].mxu0 %v6593_v49  ;;  %v1527_v43 = vsub.f32 %v6824_v4, %v7893_v58  ;;  %v6858_v4 = vpop.trf.xlu1 }
 0x123   :  { %v1326_v17 = vsel %vm108_vm0, %v1279_v10, 0  ;;  %5472 = vmatprep.mubr.f32.mxu0 %v6603_v62 }
 0x124   :  { %v7896_v31 = vand.u32 4294901760, %v6836_v8  ;;  %v6847_v32 = vand.u32 4294901760, %v1326_v17  ;;  %v1528_v57 = vand.u32 4294901760, %v1527_v43 }
 0x126   :  { %7992 = vst [vmem:[#allocation36_spill] sm:$0xff] %v6847_v32  ;;  %v6850_v60 = vsub.f32 %v1326_v17, %v6847_v32  ;;  %5473 = vmatmul.mubr.f32.gmra.mrb[10].mxu0 %v6613_v12  ;;  %5580 = vmatmul.mubr.f32.gmra.mrb[12].mxu1 %v1528_v57  ;;  %v1537_v58 = vsub.f32 %v6836_v8, %v7896_v31  ;;  %v6866_v57 = vpop.trf.xlu1  ;;  %v7993_v31 = vand.u32 4294901760, %v6505_v35  ;;  %v7996_v35 = vand.u32 4294901760, %v6532_v54 }
 0x127   :  { %5475 = vmatprep.mubr.f32.mxu0 %v6623_v28  ;;  %v8000_v54 = vand.u32 4294901760, %v6573_v20  ;;  %v8004_v20 = vand.u32 4294901760, %v6613_v12 }
 0x128   :  { %v7897_v10 = vand.u32 4294901760, %v6850_v60  ;;  %v1538_v55 = vand.u32 4294901760, %v1537_v58  ;;  %v7994_v58 = vand.u32 4294901760, %v6512_v40  ;;  %v7998_v40 = vand.u32 4294901760, %v6553_v6 }
 0x12a   :  { %5476 = vmatmul.mubr.f32.gmra.mrb[12].mxu0 %v6633_v53  ;;  %5582 = vmatprep.mubr.f32.mxu1 %v1538_v55  ;;  %v1547_v43 = vsub.f32 %v6850_v60, %v7897_v10  ;;  %v7995_v55 = vand.u32 4294901760, %v6522_v47  ;;  %v7999_v47 = vand.u32 4294901760, %v6563_v13  ;;  %v8003_v13 = vand.u32 4294901760, %v6603_v62  ;;  %v8021_v10 = vld [vmem:[#allocation21_spill] sm:$0xff] }
 0x12b   :  { %5478 = vmatprep.mubr.f32.mxu0 %v6643_v14  ;;  %v8007_v62 = vand.u32 4294901760, %v6643_v14 }
 0x12c   :  { %v1548_v17 = vand.u32 4294901760, %v1547_v43  ;;  %v6879_v43 = vpop.trf.xlu1 }
 0x12e   :  { %5479 = vmatmul.mubr.f32.gmra.mrb[14].mxu0 %v6653_v50  ;;  %5583 = vmatmul.mubr.f32.gmra.mrb[14].mxu1 %v1548_v17  ;;  %v8005_v17 = vand.u32 4294901760, %v6623_v28  ;;  %v8008_v28 = vand.u32 4294901760, %v6653_v50  ;;  %v8009_v50 = vld [vmem:[#allocation15_spill] sm:$0xff] }
 0x12f   :  { %5483 = vmatprep.mubr.f32.mxu0 %v7993_v31  ;;  %5587 = vmatprep.mubr.f32.mxu1 %v6660_v0  ;;  %v8002_v31 = vand.u32 4294901760, %v6593_v49  ;;  %v8006_v49 = vand.u32 4294901760, %v6633_v53 }
 0x132   :  { %5484 = vmatmul.mubr.f32.vlgmr.msra.gmra.mrb[0].mxu0 %v7994_v58  ;;  %5588 = vmatmul.mubr.f32.vlgmr.msra.gmra.mrb[0].mxu1 %v6669_v19  ;;  %v2589_v58 = vsel %vm2587_vm1, %v6476_v21, 0 }
 0x133   :  { %5612 = vmatpush3.msra.mxu1 %v6488_v26  ;;  %5486 = vmatprep.mubr.f32.mxu0 %v7995_v55  ;;  %v7997_v26 = vand.u32 4294901760, %v6543_v61  ;;  %v8001_v61 = vand.u32 4294901760, %v6583_v36  ;;  %v6934_v53 = vand.u32 4294901760, %v2589_v58  ;;  %v8010_v55 = vld [vmem:[#allocation23_spill] sm:$0xff] }
 0x134   :  { %5590 = vmatprep.mubr.f32.mxu1 %v6681_v9  ;;  %5508 = vmatpush3.msra.mxu0 %v6483_v23  ;;  %v6892_v23 = vpop.trf.xlu1 }
 0x135   :  { %5637 = vmatprep.subr.mxu1 %v6470_v5  ;;  %5533 = vmatprep.subr.mxu0 %v6468_v3 }
 0x136   :  { %5487 = vmatmul.mubr.f32.gmra.mrb[2].mxu0 %v7996_v35  ;;  %5591 = vmatmul.mubr.f32.gmra.mrb[2].mxu1 %v6694_v63  ;;  %v8011_v35 = vld [vmem:[#allocation16_spill] sm:$0xff] }
 0x137   :  { %5489 = vmatprep.mubr.f32.mxu0 %v7997_v26  ;;  %5593 = vmatprep.mubr.f32.mxu1 %v6708_v16  ;;  %v8012_v26 = vld [vmem:[#allocation24_spill] sm:$0xff] }
 0x138   :  { %v6903_v6 = vpop.trf.xlu1 }
 0x13a   :  { %5490 = vmatmul.mubr.f32.gmra.mrb[4].mxu0 %v7998_v40  ;;  %5594 = vmatmul.mubr.f32.gmra.mrb[4].mxu1 %v6721_v41  ;;  %v8013_v40 = vld [vmem:[#allocation17_spill] sm:$0xff] }
 0x13b   :  { %5492 = vmatprep.mubr.f32.mxu0 %v7999_v47  ;;  %5596 = vmatprep.mubr.f32.mxu1 %v6733_v1  ;;  %v8014_v47 = vld [vmem:[#allocation26_spill] sm:$0xff] }
 0x13c   :  { %v6914_v36 = vpop.trf.xlu1 }
 0x13e   :  { %5493 = vmatmul.mubr.f32.gmra.mrb[6].mxu0 %v8000_v54  ;;  %5597 = vmatmul.mubr.f32.gmra.mrb[6].mxu1 %v6745_v51 }
 0x13f   :  { %5495 = vmatprep.mubr.f32.mxu0 %v8001_v61  ;;  %5599 = vmatprep.mubr.f32.mxu1 %v6757_v39  ;;  %v8015_v61 = vld [vmem:[#allocation18_spill] sm:$0xff] }
 0x140   :  { %v6925_v12 = vpop.trf.xlu1 }
 0x142   :  { %5496 = vmatmul.mubr.f32.gmra.mrb[8].mxu0 %v8002_v31  ;;  %5600 = vmatmul.mubr.f32.gmra.mrb[8].mxu1 %v6769_v24  ;;  %v8016_v31 = vld [vmem:[#allocation28_spill] sm:$0xff] }
 0x143   :  { %5498 = vmatprep.mubr.f32.mxu0 %v8003_v13  ;;  %5602 = vmatprep.mubr.f32.mxu1 %v6781_v48  ;;  %v8017_v13 = vld [vmem:[#allocation19_spill] sm:$0xff]  ;;  %v8025_v48 = vand.u32 4294901760, %v6684_v56 }
 0x144   :  { %v6938_v14 = vpop.trf.xlu1 }
 0x146   :  { %5499 = vmatmul.mubr.f32.gmra.mrb[10].mxu0 %v8004_v20  ;;  %5603 = vmatmul.mubr.f32.gmra.mrb[10].mxu1 %v6794_v44  ;;  %v8018_v20 = vld [vmem:[#allocation30_spill] sm:$0xff]  ;;  %v8024_v44 = vand.u32 4294901760, %v6673_v7 }
 0x147   :  { %5501 = vmatprep.mubr.f32.mxu0 %v8005_v17  ;;  %5605 = vmatprep.mubr.f32.mxu1 %v6807_v34  ;;  %v6973_v17 = vsub.f32 %v2589_v58, %v6934_v53  ;;  %v8023_v58 = vand.u32 4294901760, %v6663_v42 }
 0x148   :  { %v6950_v21 = vpop.trf.xlu1 }
 0x14a   :  { %5502 = vmatmul.mubr.f32.gmra.mrb[12].mxu0 %v8006_v49  ;;  %5606 = vmatmul.mubr.f32.gmra.mrb[12].mxu1 %v6819_v46  ;;  %v8019_v49 = vld [vmem:[#allocation20_spill] sm:$0xff] }
 0x14b   :  { %5504 = vmatprep.mubr.f32.mxu0 %v8007_v62  ;;  %5608 = vmatprep.mubr.f32.mxu1 %v6833_v37  ;;  %v8020_v62 = vld [vmem:[#allocation33_spill] sm:$0xff]  ;;  %v8022_v37 = vld [vmem:[#allocation22_spill] sm:$0xff] }
 0x14e   :  { %5505 = vmatmul.mubr.f32.gmra.mrb[14].mxu0 %v8008_v28  ;;  %5609 = vmatmul.mubr.f32.gmra.mrb[14].mxu1 %v6847_v32  ;;  %v6982_v32 = vand.u32 4294901760, %v6973_v17 }
 0x14f   :  { %5509 = vmatprep.mubr.f32.mxu0 %v6499_v33  ;;  %5613 = vmatprep.mubr.f32.mxu1 %v6663_v42  ;;  %v8030_v42 = vand.u32 4294901760, %v6736_v29 }
 0x150   :  { %v2821_v34 = vsub.f32 %v6973_v17, %v6982_v32 }
 0x152   :  { %5510 = vmatmul.mubr.f32.vlgmr.msra.gmra.mrb[0].mxu0 %v6508_v38  ;;  %5614 = vmatmul.mubr.f32.vlgmr.msra.gmra.mrb[0].mxu1 %v6673_v7 }
 0x153   :  { %5638 = vmatpush3.msra.mxu1 %v6470_v5  ;;  %5512 = vmatprep.mubr.f32.mxu0 %v6519_v45 }
 0x154   :  { %5616 = vmatprep.mubr.f32.mxu1 %v6684_v56  ;;  %5534 = vmatpush3.msra.mxu0 %v6468_v3  ;;  %v6958_v3 = vpop.trf.xlu1 }
 0x155   :  { %5663 = vmatprep.subr.mxu1 %v6491_v27  ;;  %5715 = vmatprep.subr.mxu0 %v6934_v53 }
 0x156   :  { %5513 = vmatmul.mubr.f32.gmra.mrb[2].mxu0 %v6529_v52  ;;  %5617 = vmatmul.mubr.f32.gmra.mrb[2].mxu1 %v6698_v25 }
 0x157   :  { %5515 = vmatprep.mubr.f32.mxu0 %v6539_v59  ;;  %5619 = vmatprep.mubr.f32.mxu1 %v6712_v15 }
 0x158   :  { %v6966_v54 = vpop.trf.xlu1 }
 0x15a   :  { %5516 = vmatmul.mubr.f32.gmra.mrb[4].mxu0 %v6550_v2  ;;  %5620 = vmatmul.mubr.f32.gmra.mrb[4].mxu1 %v6724_v22 }
 0x15b   :  { %5518 = vmatprep.mubr.f32.mxu0 %v6560_v11  ;;  %5622 = vmatprep.mubr.f32.mxu1 %v6736_v29 }
 0x15c   :  { %v6977_v28 = vpop.trf.xlu1 }
 0x15e   :  { %5519 = vmatmul.mubr.f32.gmra.mrb[6].mxu0 %v6570_v18  ;;  %5623 = vmatmul.mubr.f32.gmra.mrb[6].mxu1 %v6748_v30 }
 0x15f   :  { %5521 = vmatprep.mubr.f32.mxu0 %v8009_v50  ;;  %5625 = vmatprep.mubr.f32.mxu1 %v8010_v55 }
 0x160   :  { %v6989_v46 = vpop.trf.xlu1 }
 0x162   :  { %5522 = vmatmul.mubr.f32.gmra.mrb[8].mxu0 %v8011_v35  ;;  %5626 = vmatmul.mubr.f32.gmra.mrb[8].mxu1 %v8012_v26 }
 0x163   :  { %5524 = vmatprep.mubr.f32.mxu0 %v8013_v40  ;;  %5628 = vmatprep.mubr.f32.mxu1 %v8014_v47 }
 0x164   :  { %v7007_v7 = vpop.trf.xlu1 }
 0x166   :  { %5525 = vmatmul.mubr.f32.gmra.mrb[10].mxu0 %v8015_v61  ;;  %5629 = vmatmul.mubr.f32.gmra.mrb[10].mxu1 %v8016_v31 }
 0x167   :  { %5527 = vmatprep.mubr.f32.mxu0 %v8017_v13  ;;  %5631 = vmatprep.mubr.f32.mxu1 %v8018_v20 }
 0x16a   :  { %5528 = vmatmul.mubr.f32.gmra.mrb[12].mxu0 %v8019_v49  ;;  %5632 = vmatmul.mubr.f32.gmra.mrb[12].mxu1 %v8020_v62 }
 0x16b   :  { %5530 = vmatprep.mubr.f32.mxu0 %v8021_v10  ;;  %5634 = vmatprep.mubr.f32.mxu1 %v6836_v8 }
 0x16e   :  { %5531 = vmatmul.mubr.f32.gmra.mrb[14].mxu0 %v8022_v37  ;;  %5635 = vmatmul.mubr.f32.gmra.mrb[14].mxu1 %v6850_v60 }
 0x16f   :  { %5535 = vmatprep.mubr.f32.mxu0 %v6499_v33  ;;  %5639 = vmatprep.mubr.f32.mxu1 %v8023_v58  ;;  %v7001_v33 = vand.u32 4294901760, %v2821_v34  ;;  %v2549_v34 = vsel %vm2538_vm2, %v6866_v57, 0 }
 0x170   :  { %v7057_v57 = vand.u32 4294901760, %v2549_v34 }
 0x172   :  { %5536 = vmatmul.mubr.f32.vlgmr.msra.gmra.mrb[0].mxu0 %v6508_v38  ;;  %5640 = vmatmul.mubr.f32.vlgmr.msra.gmra.mrb[0].mxu1 %v8024_v44  ;;  %v8026_v38 = vand.u32 4294901760, %v6698_v25  ;;  %v8031_v25 = vld [vmem:[#allocation35_spill] sm:$0xff]  ;;  %v8032_v44 = vand.u32 4294901760, %v6748_v30  ;;  %v2552_v30 = vsel %vm2538_vm2, %v6879_v43, 0  ;;  %v2555_v43 = vsel %vm2538_vm2, %v6892_v23, 0 }
 0x173   :  { %5664 = vmatpush3.msra.mxu1 %v6491_v27  ;;  %5538 = vmatprep.mubr.f32.mxu0 %v6519_v45  ;;  %v8027_v27 = vand.u32 4294901760, %v6712_v15  ;;  %v8028_v45 = vld [vmem:[#allocation32_spill] sm:$0xff]  ;;  %v2543_v15 = vsel %vm2538_vm2, %v8031_v25, 0  ;;  %v8037_v23 = vand.u32 4294901760, %v8018_v20  ;;  %v8038_v25 = vand.u32 4294901760, %v8020_v62 }
 0x174   :  { %5642 = vmatprep.mubr.f32.mxu1 %v8025_v48  ;;  %5689 = vmatprep.subr.mxu1 %v6470_v5  ;;  %v2540_v56 = vsel %vm2538_vm2, %v8028_v45, 0  ;;  %v7021_v48 = vpop.trf.xlu1 }
 0x175   :  { %5716 = vmatpush3.msra.mxu0 %v6934_v53 }
 0x176   :  { %5539 = vmatmul.mubr.f32.gmra.mrb[2].mxu0 %v6529_v52  ;;  %5643 = vmatmul.mubr.f32.gmra.mrb[2].mxu1 %v8026_v38  ;;  %v8029_v52 = vand.u32 4294901760, %v6724_v22  ;;  %v7035_v22 = vand.u32 4294901760, %v2543_v15  ;;  %v7064_v38 = vand.u32 4294901760, %v2552_v30 }
 0x177   :  { %5541 = vmatprep.mubr.f32.mxu0 %v6539_v59  ;;  %5645 = vmatprep.mubr.f32.mxu1 %v8027_v27  ;;  %v7023_v59 = vand.u32 4294901760, %v2540_v56  ;;  %v7072_v27 = vand.u32 4294901760, %v2555_v43 }
 0x178   :  { %5741 = vmatprep.subr.mxu0 %v7001_v33  ;;  %v7055_v58 = vsub.f32 %v2543_v15, %v7035_v22 }
 0x179   :  { %v7038_v29 = vsub.f32 %v2540_v56, %v7023_v59  ;;  %v7081_v56 = vsub.f32 %v2549_v34, %v7057_v57  ;;  %v2567_v34 = vsel %vm2538_vm2, %v6938_v14, 0 }
 0x17a   :  { %5542 = vmatmul.mubr.f32.gmra.mrb[4].mxu0 %v6550_v2  ;;  %5646 = vmatmul.mubr.f32.gmra.mrb[4].mxu1 %v8029_v52  ;;  %v2546_v2 = vsel %vm2538_vm2, %v6858_v4, 0  ;;  %v8034_v4 = vand.u32 4294901760, %v8012_v26 }
 0x17b   :  { %5544 = vmatprep.mubr.f32.mxu0 %v6560_v11  ;;  %5648 = vmatprep.mubr.f32.mxu1 %v8030_v42  ;;  %v8033_v11 = vand.u32 4294901760, %v8010_v55  ;;  %v8035_v55 = vand.u32 4294901760, %v8014_v47  ;;  %v7918_v26 = vand.u32 4294901760, %v7038_v29  ;;  %v8036_v47 = vand.u32 4294901760, %v8016_v31 }
 0x17c   :  { %v7088_v31 = vsub.f32 %v2552_v30, %v7064_v38  ;;  %v2564_v42 = vsel %vm2538_vm2, %v6925_v12, 0  ;;  %v8040_v12 = vand.u32 4294901760, %v6836_v8  ;;  %v7911_v62 = vand.u32 4294901760, %v7081_v56 }
 0x17d   :  { %v8042_v8 = vand.u32 4294901760, %v6850_v60 }
 0x17e   :  { %5545 = vmatmul.mubr.f32.gmra.mrb[6].mxu0 %v6570_v18  ;;  %5649 = vmatmul.mubr.f32.gmra.mrb[6].mxu1 %v8032_v44  ;;  %v7042_v18 = vand.u32 4294901760, %v2546_v2 }
 0x17f   :  { %5547 = vmatprep.mubr.f32.mxu0 %v8009_v50  ;;  %5651 = vmatprep.mubr.f32.mxu1 %v8033_v11  ;;  %v7049_v50 = vpop.trf.xlu1  ;;  %v7910_v11 = vand.u32 4294901760, %v7088_v31 }
 0x182   :  { %5548 = vmatmul.mubr.f32.gmra.mrb[8].mxu0 %v8011_v35  ;;  %5652 = vmatmul.mubr.f32.gmra.mrb[8].mxu1 %v8034_v4  ;;  %v2558_v35 = vsel %vm2538_vm2, %v6903_v6, 0  ;;  %v7917_v6 = vand.u32 4294901760, %v7055_v58 }
 0x183   :  { %5550 = vmatprep.mubr.f32.mxu0 %v8013_v40  ;;  %5654 = vmatprep.mubr.f32.mxu1 %v8035_v55  ;;  %v7067_v40 = vsub.f32 %v2546_v2, %v7042_v18  ;;  %v7074_v45 = vand.u32 4294901760, %v2558_v35  ;;  %v7085_v52 = vpop.trf.xlu1  ;;  %v7114_v2 = vand.u32 4294901760, %v2564_v42 }
 0x185   :  { %v7914_v20 = vand.u32 4294901760, %v7067_v40  ;;  %v7103_v15 = vsub.f32 %v2558_v35, %v7074_v45  ;;  %8041 = vst [vmem:[#allocation23_spill] sm:$0xff] %v7114_v2  ;;  %v7136_v60 = vsub.f32 %v2564_v42, %v7114_v2  ;;  %v2576_v42 = vsel %vm2538_vm2, %v6966_v54, 0 }
 0x186   :  { %5551 = vmatmul.mubr.f32.gmra.mrb[10].mxu0 %v8015_v61  ;;  %5655 = vmatmul.mubr.f32.gmra.mrb[10].mxu1 %v8036_v47  ;;  %v2561_v61 = vsel %vm2538_vm2, %v6914_v36, 0  ;;  %v7100_v36 = vsub.f32 %v2555_v43, %v7072_v27  ;;  %v2690_v47 = vsub.f32 %v7081_v56, %v7911_v62 }
 0x187   :  { %5553 = vmatprep.mubr.f32.mxu0 %v8017_v13  ;;  %5657 = vmatprep.mubr.f32.mxu1 %v8037_v23  ;;  %v2660_v13 = vsub.f32 %v7038_v29, %v7918_v26  ;;  %v7105_v44 = vand.u32 4294901760, %v2561_v61  ;;  %v2680_v4 = vsub.f32 %v7067_v40, %v7914_v20  ;;  %v7127_v55 = vpop.trf.xlu1  ;;  %v7913_v35 = vand.u32 4294901760, %v7103_v15  ;;  %v8044_v23 = vld [vmem:[#allocation14_spill] sm:$0xff] }
 0x188   :  { %v7912_v43 = vand.u32 4294901760, %v7100_v36 }
 0x189   :  { %8039 = vst [vmem:[#allocation15_spill] sm:$0xff] %v7105_v44  ;;  %v2661_v30 = vand.u32 4294901760, %v2660_v13  ;;  %v7132_v14 = vsub.f32 %v2561_v61, %v7105_v44  ;;  %v7144_v13 = vand.u32 4294901760, %v8044_v23  ;;  %v2573_v61 = vsel %vm2538_vm2, %v6958_v3, 0 }
 0x18a   :  { %5554 = vmatmul.mubr.f32.gmra.mrb[12].mxu0 %v8019_v49  ;;  %5658 = vmatmul.mubr.f32.gmra.mrb[12].mxu1 %v8038_v25  ;;  %v2670_v49 = vsub.f32 %v7055_v58, %v7917_v6  ;;  %v2710_v3 = vsub.f32 %v7100_v36, %v7912_v43  ;;  %v7177_v43 = vand.u32 4294901760, %v2576_v42 }
 0x18b   :  { %5556 = vmatprep.mubr.f32.mxu0 %v8021_v10  ;;  %5660 = vmatprep.mubr.f32.mxu1 %v8040_v12  ;;  %v2570_v10 = vsel %vm2538_vm2, %v6950_v21, 0  ;;  %v7138_v21 = vand.u32 4294901760, %v2567_v34  ;;  %v2700_v12 = vsub.f32 %v7088_v31, %v7910_v11  ;;  %v7916_v11 = vand.u32 4294901760, %v7136_v60 }
 0x18c   :  { %v7146_v25 = vand.u32 4294901760, %v2570_v10  ;;  %8049 = vst [vmem:[#allocation28_spill] sm:$0xff] %v7177_v43 }
 0x18d   :  { %8043 = vst [vmem:[#allocation16_spill] sm:$0xff] %v7138_v21  ;;  %v7167_v54 = vsub.f32 %v2567_v34, %v7138_v21  ;;  %v2701_v20 = vand.u32 4294901760, %v2700_v12  ;;  %v2711_v34 = vand.u32 4294901760, %v2710_v3 }
 0x18e   :  { %5557 = vmatmul.mubr.f32.gmra.mrb[14].mxu0 %v8022_v37  ;;  %5661 = vmatmul.mubr.f32.gmra.mrb[14].mxu1 %v8042_v8  ;;  %v2671_v37 = vand.u32 4294901760, %v2670_v49  ;;  %8045 = vst [vmem:[#allocation24_spill] sm:$0xff] %v7146_v25  ;;  %v2681_v49 = vand.u32 4294901760, %v2680_v4  ;;  %v2720_v8 = vsub.f32 %v7103_v15, %v7913_v35  ;;  %v7169_v4 = vand.u32 4294901760, %v2573_v61 }
 0x18f   :  { %5665 = vmatprep.mubr.f32.mxu1 %v6660_v0  ;;  %5717 = vmatprep.mubr.f32.mxu0 %v2661_v30  ;;  %v7915_v30 = vand.u32 4294901760, %v7132_v14  ;;  %8046 = vst [vmem:[#allocation17_spill] sm:$0xff] %v7167_v54  ;;  %v7175_v62 = vsub.f32 %v2570_v10, %v7146_v25  ;;  %v2579_v35 = vsel %vm2538_vm2, %v6977_v28, 0 }
 0x190   :  { %8047 = vst [vmem:[#allocation26_spill] sm:$0xff] %v7169_v4  ;;  %v2721_v10 = vand.u32 4294901760, %v2720_v8  ;;  %v7192_v12 = vsub.f32 %v2573_v61, %v7169_v4  ;;  %v2585_v8 = vsel %vm2538_vm2, %v7007_v7, 0 }
 0x191   :  { %8048 = vst [vmem:[#allocation18_spill] sm:$0xff] %v7175_v62  ;;  %v2730_v28 = vsub.f32 %v7132_v14, %v7915_v30 }
 0x192   :  { %5666 = vmatmul.mubr.f32.vlgmr.msra.gmra.mrb[0].mxu1 %v6669_v19  ;;  %5718 = vmatmul.mubr.f32.vlgmr.msra.gmra.mrb[16].mxu0 %v2671_v37  ;;  %v2691_v37 = vand.u32 4294901760, %v2690_v47  ;;  %v7919_v47 = vand.u32 4294901760, %v7167_v54  ;;  %8050 = vst [vmem:[#allocation19_spill] sm:$0xff] %v7192_v12 }
 0x193   :  { %5690 = vmatpush3.msra.mxu1 %v6470_v5  ;;  %5668 = vmatprep.mubr.f32.mxu1 %v6681_v9  ;;  %v7172_v5 = vpop.trf.xlu1  ;;  %v2731_v30 = vand.u32 4294901760, %v2730_v28 }
 0x194   :  { %5720 = vmatprep.mubr.f32.mxu0 %v2681_v49  ;;  %5742 = vmatpush3.msra.mxu0 %v7001_v33  ;;  %v2582_v33 = vsel %vm2538_vm2, %v6989_v46, 0  ;;  %v7194_v49 = vand.u32 4294901760, %v2579_v35  ;;  %v2740_v46 = vsub.f32 %v7136_v60, %v7916_v11  ;;  %v7924_v11 = vand.u32 4294901760, %v7192_v12 }
 0x195   :  { %5871 = vmatprep.subr.mxu1 %v7144_v13  ;;  %5767 = vmatprep.subr.mxu0 %v6973_v17  ;;  %v7203_v3 = vand.u32 4294901760, %v2582_v33  ;;  %v2750_v7 = vsub.f32 %v7167_v54, %v7919_v47 }
 0x196   :  { %5669 = vmatmul.mubr.f32.gmra.mrb[2].mxu1 %v6694_v63  ;;  %5721 = vmatmul.mubr.f32.gmra.mrb[18].mxu0 %v2691_v37  ;;  %8051 = vst [vmem:[#allocation30_spill] sm:$0xff] %v7194_v49  ;;  %v7213_v6 = vsub.f32 %v2579_v35, %v7194_v49  ;;  %v2741_v37 = vand.u32 4294901760, %v2740_v46 }
 0x197   :  { %5671 = vmatprep.mubr.f32.mxu1 %v6708_v16  ;;  %5723 = vmatprep.mubr.f32.mxu0 %v2701_v20  ;;  %v7201_v20 = vsub.f32 %v2576_v42, %v7177_v43  ;;  %8053 = vst [vmem:[#allocation33_spill] sm:$0xff] %v7203_v3  ;;  %v7208_v61 = vpop.trf.xlu1  ;;  %v7215_v42 = vand.u32 4294901760, %v2585_v8  ;;  %v2751_v26 = vand.u32 4294901760, %v2750_v7 }
 0x198   :  { %8054 = vst [vmem:[#allocation21_spill] sm:$0xff] %v7213_v6  ;;  %v7927_v35 = vand.u32 4294901760, %v7213_v6 }
 0x199   :  { %8052 = vst [vmem:[#allocation20_spill] sm:$0xff] %v7201_v20  ;;  %8055 = vst [vmem:[#allocation22_spill] sm:$0xff] %v7215_v42  ;;  %v7231_v47 = vsub.f32 %v2585_v8, %v7215_v42  ;;  %v8062_v8 = vld [vmem:[#allocation29_spill] sm:$0xff] }
 0x19a   :  { %5672 = vmatmul.mubr.f32.gmra.mrb[4].mxu1 %v6721_v41  ;;  %5724 = vmatmul.mubr.f32.gmra.mrb[20].mxu0 %v2711_v34  ;;  %v7222_v34 = vsub.f32 %v2582_v33, %v7203_v3  ;;  %v2770_v33 = vsub.f32 %v7192_v12, %v7924_v11  ;;  %v2790_v11 = vsub.f32 %v7213_v6, %v7927_v35  ;;  %v8064_v12 = vld [vmem:[#allocation31_spill] sm:$0xff] }
 0x19b   :  { %5674 = vmatprep.mubr.f32.mxu1 %v6733_v1  ;;  %5726 = vmatprep.mubr.f32.mxu0 %v2721_v10  ;;  %v8057_v10 = vand.u32 4294901760, %v7175_v62  ;;  %v7236_v46 = vpop.trf.xlu1  ;;  %v8063_v35 = vand.u32 4294901760, %v7231_v47 }
 0x19c   :  { %8056 = vst [vmem:[#allocation32_spill] sm:$0xff] %v7222_v34  ;;  %v2771_v7 = vand.u32 4294901760, %v2770_v33  ;;  %v2791_v33 = vand.u32 4294901760, %v2790_v11  ;;  %v8066_v11 = vld [vmem:[#allocation36_spill] sm:$0xff] }
 0x19d   :  { %v2760_v28 = vsub.f32 %v7175_v62, %v8057_v10  ;;  %v2810_v6 = vsub.f32 %v7231_v47, %v8063_v35 }
 0x19e   :  { %5675 = vmatmul.mubr.f32.gmra.mrb[6].mxu1 %v6745_v51  ;;  %5727 = vmatmul.mubr.f32.gmra.mrb[22].mxu0 %v2731_v30  ;;  %v8058_v30 = vand.u32 4294901760, %v7201_v20 }
 0x19f   :  { %5677 = vmatprep.mubr.f32.mxu1 %v6757_v39  ;;  %5729 = vmatprep.mubr.f32.mxu0 %v2741_v37  ;;  %v2761_v62 = vand.u32 4294901760, %v2760_v28  ;;  %v8059_v37 = vld [vmem:[#allocation25_spill] sm:$0xff]  ;;  %v7250_v28 = vsub.f32 %v8044_v23, %v7144_v13 }
 0x1a0   :  { %v2780_v54 = vsub.f32 %v7201_v20, %v8058_v30  ;;  %v8060_v30 = vand.u32 4294901760, %v7222_v34 }
 0x1a2   :  { %5678 = vmatmul.mubr.f32.gmra.mrb[8].mxu1 %v6769_v24  ;;  %5730 = vmatmul.mubr.f32.gmra.mrb[24].mxu0 %v2751_v26  ;;  %v2781_v10 = vand.u32 4294901760, %v2780_v54  ;;  %v2800_v20 = vsub.f32 %v7222_v34, %v8060_v30  ;;  %v8061_v26 = vld [vmem:[#allocation27_spill] sm:$0xff]  ;;  %v7263_v54 = vand.u32 4294901760, %v7250_v28  ;;  %v8065_v30 = vld [vmem:[#allocation34_spill] sm:$0xff] }
 0x1a3   :  { %5680 = vmatprep.mubr.f32.mxu1 %v8059_v37  ;;  %5732 = vmatprep.mubr.f32.mxu0 %v2761_v62  ;;  %v7256_v62 = vpop.trf.xlu1 }
 0x1a4   :  { %v2801_v23 = vand.u32 4294901760, %v2800_v20 }
 0x1a6   :  { %5681 = vmatmul.mubr.f32.gmra.mrb[10].mxu1 %v8061_v26  ;;  %5733 = vmatmul.mubr.f32.gmra.mrb[26].mxu0 %v2771_v7  ;;  %v2811_v7 = vand.u32 4294901760, %v2810_v6 }
 0x1a7   :  { %5683 = vmatprep.mubr.f32.mxu1 %v8062_v8  ;;  %5735 = vmatprep.mubr.f32.mxu0 %v2781_v10  ;;  %v3706_v34 = vpop.trf.xlu1  ;;  %v3995_v10 = vsub.f32 %v7250_v28, %v7263_v54 }
 0x1a9   :  { %v7272_v20 = vand.u32 4294901760, %v3995_v10  ;;  %v3736_v10 = vsel %vm2538_vm2, %v7256_v62, 0 }
 0x1aa   :  { %5684 = vmatmul.mubr.f32.gmra.mrb[12].mxu1 %v8064_v12  ;;  %5736 = vmatmul.mubr.f32.gmra.mrb[28].mxu0 %v2791_v33 }
 0x1ab   :  { %5686 = vmatprep.mubr.f32.mxu1 %v8065_v30  ;;  %5738 = vmatprep.mubr.f32.mxu0 %v2801_v23  ;;  %v7276_v35 = vpop.trf.xlu1 }
 0x1ae   :  { %5687 = vmatmul.mubr.f32.gmra.mrb[14].mxu1 %v8066_v11  ;;  %5739 = vmatmul.mubr.f32.gmra.mrb[30].mxu0 %v2811_v7 }
 0x1af   :  { %5691 = vmatprep.mubr.f32.mxu1 %v6660_v0  ;;  %5743 = vmatprep.mubr.f32.mxu0 %v7023_v59  ;;  %v3715_v0 = vsel %vm2538_vm2, %v7021_v48, 0  ;;  %v3724_v48 = vsel %vm2538_vm2, %v7127_v55, 0  ;;  %v3733_v55 = vsel %vm2538_vm2, %v7236_v46, 0 }
 0x1b0   :  { %v7324_v6 = vand.u32 4294901760, %v3724_v48  ;;  %v7340_v7 = vand.u32 4294901760, %v3733_v55 }
 0x1b2   :  { %5692 = vmatmul.mubr.f32.vlgmr.msra.gmra.mrb[0].mxu1 %v6669_v19  ;;  %5744 = vmatmul.mubr.f32.vlgmr.msra.gmra.mrb[16].mxu0 %v7035_v22  ;;  %v3708_v19 = vpop.trf.xlu1  ;;  %v7346_v46 = vsub.f32 %v3724_v48, %v7324_v6  ;;  %v7364_v62 = vsub.f32 %v3733_v55, %v7340_v7  ;;  %v3742_v55 = vsel %vm2538_vm2, %v7276_v35, 0 }
 0x1b3   :  { %5872 = vmatpush3.msra.mxu1 %v7144_v13  ;;  %5694 = vmatprep.mubr.f32.mxu1 %v6681_v9  ;;  %v7294_v9 = vand.u32 4294901760, %v3715_v0 }
 0x1b4   :  { %5746 = vmatprep.mubr.f32.mxu0 %v7042_v18  ;;  %5768 = vmatpush3.msra.mxu0 %v6973_v17 }
 0x1b5   :  { %5897 = vmatprep.subr.mxu1 %v7272_v20  ;;  %5793 = vmatprep.subr.mxu0 %v6934_v53  ;;  %v7309_v17 = vsub.f32 %v3715_v0, %v7294_v9  ;;  %v3739_v0 = vsel %vm2538_vm2, %v3706_v34, 0 }
 0x1b6   :  { %5695 = vmatmul.mubr.f32.gmra.mrb[2].mxu1 %v6694_v63  ;;  %5747 = vmatmul.mubr.f32.gmra.mrb[18].mxu0 %v7057_v57  ;;  %v3718_v63 = vsel %vm2538_vm2, %v7049_v50, 0  ;;  %v3727_v50 = vsel %vm2538_vm2, %v7172_v5, 0 }
 0x1b7   :  { %5697 = vmatprep.mubr.f32.mxu1 %v6708_v16  ;;  %5749 = vmatprep.mubr.f32.mxu0 %v7064_v38  ;;  %v7300_v16 = vpop.trf.xlu1  ;;  %v7331_v33 = vand.u32 4294901760, %v3727_v50 }
 0x1ba   :  { %5698 = vmatmul.mubr.f32.gmra.mrb[4].mxu1 %v6721_v41  ;;  %5750 = vmatmul.mubr.f32.gmra.mrb[20].mxu0 %v7072_v27  ;;  %v3721_v41 = vsel %vm2538_vm2, %v7085_v52, 0  ;;  %v3730_v52 = vsel %vm2538_vm2, %v7208_v61, 0 }
 0x1bb   :  { %5700 = vmatprep.mubr.f32.mxu1 %v6733_v1  ;;  %5752 = vmatprep.mubr.f32.mxu0 %v7074_v45  ;;  %v7306_v1 = vand.u32 4294901760, %v3718_v63  ;;  %v3710_v5 = vpop.trf.xlu1  ;;  %v7338_v23 = vand.u32 4294901760, %v3730_v52 }
 0x1bd   :  { %v7361_v48 = vsub.f32 %v3730_v52, %v7338_v23 }
 0x1be   :  { %5701 = vmatmul.mubr.f32.gmra.mrb[6].mxu1 %v6745_v51  ;;  %5753 = vmatmul.mubr.f32.gmra.mrb[22].mxu0 %v7105_v44  ;;  %v7313_v51 = vand.u32 4294901760, %v3721_v41 }
 0x1bf   :  { %5703 = vmatprep.mubr.f32.mxu1 %v6757_v39  ;;  %5755 = vmatprep.mubr.f32.mxu0 %v7114_v2  ;;  %v7322_v39 = vsub.f32 %v3718_v63, %v7306_v1 }
 0x1c1   :  { %v7937_v61 = vand.u32 4294901760, %v7322_v39 }
 0x1c2   :  { %5704 = vmatmul.mubr.f32.gmra.mrb[8].mxu1 %v6769_v24  ;;  %5756 = vmatmul.mubr.f32.gmra.mrb[24].mxu0 %v7138_v21  ;;  %v7934_v24 = vand.u32 4294901760, %v7309_v17 }
 0x1c3   :  { %5706 = vmatprep.mubr.f32.mxu1 %v8059_v37  ;;  %5758 = vmatprep.mubr.f32.mxu0 %v7146_v25  ;;  %v7334_v37 = vsub.f32 %v3721_v41, %v7313_v51  ;;  %v3711_v41 = vpop.trf.xlu1  ;;  %v3844_v34 = vsub.f32 %v7322_v39, %v7937_v61 }
 0x1c4   :  { %v3834_v63 = vsub.f32 %v7309_v17, %v7934_v24  ;;  %v7374_v24 = vand.u32 4294901760, %v3739_v0 }
 0x1c5   :  { %v3845_v35 = vand.u32 4294901760, %v3844_v34 }
 0x1c6   :  { %5707 = vmatmul.mubr.f32.gmra.mrb[10].mxu1 %v8061_v26  ;;  %5759 = vmatmul.mubr.f32.gmra.mrb[26].mxu0 %v7169_v4  ;;  %v7351_v26 = vsub.f32 %v3727_v50, %v7331_v33  ;;  %v7366_v50 = vand.u32 4294901760, %v3736_v10  ;;  %v8073_v4 = vand.u32 4294901760, %v7364_v62 }
 0x1c7   :  { %5709 = vmatprep.mubr.f32.mxu1 %v8062_v8  ;;  %5761 = vmatprep.mubr.f32.mxu0 %v7177_v43  ;;  %v3835_v8 = vand.u32 4294901760, %v3834_v63  ;;  %v8070_v63 = vand.u32 4294901760, %v7346_v46 }
 0x1c8   :  { %v7388_v52 = vsub.f32 %v3736_v10, %v7366_v50  ;;  %v3748_v10 = vsel %vm2538_vm2, %v7300_v16, 0 }
 0x1ca   :  { %5710 = vmatmul.mubr.f32.gmra.mrb[12].mxu1 %v8064_v12  ;;  %5762 = vmatmul.mubr.f32.gmra.mrb[28].mxu0 %v7194_v49  ;;  %v3745_v49 = vsel %vm2538_vm2, %v3708_v19, 0  ;;  %8068 = vst [vmem:[#allocation35_spill] sm:$0xff] %v7388_v52  ;;  %v7392_v19 = vsub.f32 %v3739_v0, %v7374_v24  ;;  %v3751_v0 = vsel %vm2538_vm2, %v3710_v5, 0 }
 0x1cb   :  { %5712 = vmatprep.mubr.f32.mxu1 %v8065_v30  ;;  %5764 = vmatprep.mubr.f32.mxu0 %v7203_v3  ;;  %v8067_v30 = vand.u32 4294901760, %v7334_v37  ;;  %v7399_v12 = vand.u32 4294901760, %v3745_v49  ;;  %v8071_v3 = vand.u32 4294901760, %v7351_v26  ;;  %v7427_v25 = vand.u32 4294901760, %v3751_v0 }
 0x1cc   :  { %8069 = vst [vmem:[#allocation14_spill] sm:$0xff] %v7392_v19  ;;  %v8078_v2 = vand.u32 4294901760, %v7392_v19 }
 0x1cd   :  { %v3854_v61 = vsub.f32 %v7334_v37, %v8067_v30  ;;  %v3864_v30 = vsub.f32 %v7346_v46, %v8070_v63  ;;  %v8072_v63 = vand.u32 4294901760, %v7361_v48 }
 0x1ce   :  { %5713 = vmatmul.mubr.f32.gmra.mrb[14].mxu1 %v8066_v11  ;;  %5765 = vmatmul.mubr.f32.gmra.mrb[30].mxu0 %v7215_v42  ;;  %v7394_v11 = vand.u32 4294901760, %v3742_v55  ;;  %v3712_v42 = vpop.trf.xlu1 }
 0x1cf   :  { %5769 = vmatprep.mubr.f32.mxu0 %v7038_v29  ;;  %5873 = vmatprep.mubr.f32.mxu1 %v3835_v8  ;;  %v3874_v8 = vsub.f32 %v7351_v26, %v8071_v3  ;;  %v3855_v34 = vand.u32 4294901760, %v3854_v61  ;;  %v3884_v16 = vsub.f32 %v7361_v48, %v8072_v63  ;;  %v3894_v3 = vsub.f32 %v7364_v62, %v8073_v4 }
 0x1d0   :  { %v7419_v5 = vsub.f32 %v3742_v55, %v7394_v11  ;;  %v7421_v61 = vand.u32 4294901760, %v3748_v10  ;;  %v3865_v43 = vand.u32 4294901760, %v3864_v30  ;;  %v3754_v63 = vsel %vm2538_vm2, %v3711_v41, 0 }
 0x1d1   :  { %v3875_v21 = vand.u32 4294901760, %v3874_v8  ;;  %v3757_v4 = vsel %vm2538_vm2, %v3712_v42, 0  ;;  %v3895_v30 = vand.u32 4294901760, %v3894_v3  ;;  %v3914_v42 = vsub.f32 %v7392_v19, %v8078_v2 }
 0x1d2   :  { %5874 = vmatmul.mubr.f32.vlgmr.msra.gmra.mrb[16].mxu1 %v3845_v35  ;;  %5770 = vmatmul.mubr.f32.vlgmr.msra.gmra.mrb[16].mxu0 %v7055_v58  ;;  %8074 = vst [vmem:[#allocation25_spill] sm:$0xff] %v7419_v5  ;;  %v3713_v55 = vpop.trf.xlu1  ;;  %v7956_v8 = vand.u32 4294901760, %v7419_v5  ;;  %v7440_v35 = vsub.f32 %v3748_v10, %v7421_v61 }
 0x1d3   :  { %5898 = vmatpush3.msra.mxu1 %v7272_v20  ;;  %5772 = vmatprep.mubr.f32.mxu0 %v7067_v40  ;;  %v7425_v20 = vsub.f32 %v3745_v49, %v7399_v12  ;;  %v3885_v49 = vand.u32 4294901760, %v3884_v16  ;;  %v7451_v16 = vand.u32 4294901760, %v3757_v4  ;;  %v3760_v3 = vsel %vm2538_vm2, %v3713_v55, 0 }
 0x1d4   :  { %5876 = vmatprep.mubr.f32.mxu1 %v3855_v34  ;;  %5794 = vmatpush3.msra.mxu0 %v6934_v53  ;;  %v8076_v34 = vand.u32 4294901760, %v7388_v52  ;;  %8077 = vst [vmem:[#allocation29_spill] sm:$0xff] %v7440_v35  ;;  %v7460_v44 = vand.u32 4294901760, %v3760_v3  ;;  %v3915_v19 = vand.u32 4294901760, %v3914_v42 }
 0x1d5   :  { %8075 = vst [vmem:[#allocation27_spill] sm:$0xff] %v7425_v20  ;;  %5923 = vmatprep.subr.mxu1 %v7250_v28  ;;  %5819 = vmatprep.subr.mxu0 %v6982_v32 }
 0x1d6   :  { %5877 = vmatmul.mubr.f32.gmra.mrb[18].mxu1 %v3865_v43  ;;  %5773 = vmatmul.mubr.f32.gmra.mrb[18].mxu0 %v7081_v56  ;;  %v3904_v41 = vsub.f32 %v7388_v52, %v8076_v34  ;;  %v7442_v43 = vand.u32 4294901760, %v3754_v63  ;;  %v7961_v34 = vand.u32 4294901760, %v7440_v35  ;;  %v8084_v52 = vld [vmem:[#allocation19_spill] sm:$0xff] }
 0x1d7   :  { %5775 = vmatprep.mubr.f32.mxu0 %v7088_v31  ;;  %5879 = vmatprep.mubr.f32.mxu1 %v3875_v21  ;;  %v7449_v21 = vsub.f32 %v3751_v0, %v7427_v25  ;;  %v3924_v0 = vsub.f32 %v7419_v5, %v7956_v8  ;;  %v7476_v8 = vsub.f32 %v3760_v3, %v7460_v44 }
 0x1d8   :  { %v3905_v10 = vand.u32 4294901760, %v3904_v41  ;;  %v7458_v2 = vsub.f32 %v3754_v63, %v7442_v43 }
 0x1d9   :  { %8079 = vst [vmem:[#allocation31_spill] sm:$0xff] %v7449_v21  ;;  %v3925_v55 = vand.u32 4294901760, %v3924_v0  ;;  %v3983_v3 = vand.u32 4294901760, %v7476_v8 }
 0x1da   :  { %5880 = vmatmul.mubr.f32.gmra.mrb[20].mxu1 %v3885_v49  ;;  %5776 = vmatmul.mubr.f32.gmra.mrb[20].mxu0 %v7100_v36  ;;  %v7467_v49 = vsub.f32 %v3757_v4, %v7451_v16  ;;  %v7968_v63 = vand.u32 4294901760, %v7458_v2  ;;  %v3944_v4 = vsub.f32 %v7440_v35, %v7961_v34 }
 0x1db   :  { %5778 = vmatprep.mubr.f32.mxu0 %v7103_v15  ;;  %5882 = vmatprep.mubr.f32.mxu1 %v3895_v30  ;;  %v8080_v30 = vand.u32 4294901760, %v7425_v20 }
 0x1dc   :  { %v3973_v42 = vand.u32 4294901760, %v7467_v49  ;;  %v3945_v0 = vand.u32 4294901760, %v3944_v4  ;;  %v3964_v34 = vsub.f32 %v7458_v2, %v7968_v63 }
 0x1dd   :  { %v3934_v41 = vsub.f32 %v7425_v20, %v8080_v30  ;;  %v8082_v20 = vld [vmem:[#allocation17_spill] sm:$0xff] }
 0x1de   :  { %5883 = vmatmul.mubr.f32.gmra.mrb[22].mxu1 %v3905_v10  ;;  %5779 = vmatmul.mubr.f32.gmra.mrb[22].mxu0 %v7132_v14  ;;  %v8081_v10 = vand.u32 4294901760, %v7449_v21 }
 0x1df   :  { %5781 = vmatprep.mubr.f32.mxu0 %v7136_v60  ;;  %5885 = vmatprep.mubr.f32.mxu1 %v3915_v19  ;;  %v3935_v5 = vand.u32 4294901760, %v3934_v41  ;;  %v8083_v19 = vld [vmem:[#allocation18_spill] sm:$0xff]  ;;  %v3974_v41 = vsub.f32 %v7467_v49, %v3973_v42 }
 0x1e0   :  { %v3954_v30 = vsub.f32 %v7449_v21, %v8081_v10  ;;  %v8085_v10 = vld [vmem:[#allocation20_spill] sm:$0xff]  ;;  %v8086_v21 = vld [vmem:[#allocation21_spill] sm:$0xff] }
 0x1e1   :  { %v3975_v4 = vand.u32 4294901760, %v3974_v41  ;;  %v8109_v41 = vld [vmem:[#allocation25_spill] sm:$0xff] }
 0x1e2   :  { %5782 = vmatmul.mubr.f32.gmra.mrb[24].mxu0 %v8082_v20  ;;  %5886 = vmatmul.mubr.f32.gmra.mrb[24].mxu1 %v3925_v55  ;;  %v3955_v35 = vand.u32 4294901760, %v3954_v30  ;;  %v3965_v55 = vand.u32 4294901760, %v3964_v34  ;;  %v8087_v30 = vld [vmem:[#allocation32_spill] sm:$0xff]  ;;  %v8090_v34 = vand.u32 4294901760, %v7067_v40  ;;  %v8093_v40 = vand.u32 4294901760, %v7100_v36 }
 0x1e3   :  { %5784 = vmatprep.mubr.f32.mxu0 %v8083_v19  ;;  %5888 = vmatprep.mubr.f32.mxu1 %v3935_v5  ;;  %v3984_v5 = vsub.f32 %v7476_v8, %v3983_v3  ;;  %v8097_v36 = vand.u32 4294901760, %v8082_v20  ;;  %v8102_v20 = vand.u32 4294901760, %v8087_v30 }
 0x1e5   :  { %v3985_v63 = vand.u32 4294901760, %v3984_v5  ;;  %v8112_v5 = vld [vmem:[#allocation26_spill] sm:$0xff] }
 0x1e6   :  { %5785 = vmatmul.mubr.f32.gmra.mrb[26].mxu0 %v8084_v52  ;;  %5889 = vmatmul.mubr.f32.gmra.mrb[26].mxu1 %v3945_v0  ;;  %v8088_v0 = vand.u32 4294901760, %v7038_v29  ;;  %v8091_v29 = vand.u32 4294901760, %v7081_v56  ;;  %v8095_v56 = vand.u32 4294901760, %v7132_v14  ;;  %v8099_v14 = vand.u32 4294901760, %v8084_v52 }
 0x1e7   :  { %5787 = vmatprep.mubr.f32.mxu0 %v8085_v10  ;;  %5891 = vmatprep.mubr.f32.mxu1 %v3955_v35  ;;  %v8089_v35 = vand.u32 4294901760, %v7055_v58  ;;  %v8092_v58 = vand.u32 4294901760, %v7088_v31  ;;  %v8096_v31 = vand.u32 4294901760, %v7136_v60  ;;  %v8100_v60 = vand.u32 4294901760, %v8085_v10  ;;  %v8110_v10 = vld [vmem:[#allocation24_spill] sm:$0xff] }
 0x1e8   :  { %v8103_v52 = vand.u32 4294901760, %v7231_v47 }
 0x1ea   :  { %5788 = vmatmul.mubr.f32.gmra.mrb[28].mxu0 %v8086_v21  ;;  %5892 = vmatmul.mubr.f32.gmra.mrb[28].mxu1 %v3965_v55  ;;  %v8111_v55 = vld [vmem:[#allocation27_spill] sm:$0xff] }
 0x1eb   :  { %5790 = vmatprep.mubr.f32.mxu0 %v8087_v30  ;;  %5894 = vmatprep.mubr.f32.mxu1 %v3975_v4  ;;  %v8113_v4 = vld [vmem:[#allocation29_spill] sm:$0xff]  ;;  %v8114_v30 = vld [vmem:[#allocation28_spill] sm:$0xff] }
 0x1ee   :  { %5791 = vmatmul.mubr.f32.gmra.mrb[30].mxu0 %v7231_v47  ;;  %5895 = vmatmul.mubr.f32.gmra.mrb[30].mxu1 %v3985_v63  ;;  %v8104_v47 = vld [vmem:[#allocation15_spill] sm:$0xff]  ;;  %v8107_v63 = vld [vmem:[#allocation14_spill] sm:$0xff] }
 0x1ef   :  { %5795 = vmatprep.mubr.f32.mxu0 %v8088_v0  ;;  %5899 = vmatprep.mubr.f32.mxu1 %v7294_v9  ;;  %v8115_v0 = vld [vmem:[#allocation31_spill] sm:$0xff] }
 0x1f2   :  { %5796 = vmatmul.mubr.f32.vlgmr.msra.gmra.mrb[16].mxu0 %v8089_v35  ;;  %5900 = vmatmul.mubr.f32.vlgmr.msra.gmra.mrb[16].mxu1 %v7306_v1  ;;  %v8116_v35 = vld [vmem:[#allocation30_spill] sm:$0xff] }
 0x1f3   :  { %5924 = vmatpush3.msra.mxu1 %v7250_v28  ;;  %5798 = vmatprep.mubr.f32.mxu0 %v8090_v34  ;;  %v8101_v28 = vand.u32 4294901760, %v8086_v21  ;;  %v8106_v21 = vld [vmem:[#allocation23_spill] sm:$0xff]  ;;  %v8117_v34 = vld [vmem:[#allocation33_spill] sm:$0xff] }
 0x1f4   :  { %5902 = vmatprep.mubr.f32.mxu1 %v7313_v51  ;;  %5820 = vmatpush3.msra.mxu0 %v6982_v32  ;;  %v8094_v32 = vand.u32 4294901760, %v7103_v15  ;;  %v8098_v15 = vand.u32 4294901760, %v8083_v19  ;;  %v8108_v19 = vld [vmem:[#allocation16_spill] sm:$0xff] }
 0x1f5   :  { %5949 = vmatprep.subr.mxu1 %v7144_v13  ;;  %5845 = vmatprep.subr.mxu0 %v6934_v53 }
 0x1f6   :  { %5799 = vmatmul.mubr.f32.gmra.mrb[18].mxu0 %v8091_v29  ;;  %5903 = vmatmul.mubr.f32.gmra.mrb[18].mxu1 %v7324_v6  ;;  %v8118_v29 = vld [vmem:[#allocation22_spill] sm:$0xff] }
 0x1f7   :  { %5801 = vmatprep.mubr.f32.mxu0 %v8092_v58  ;;  %5905 = vmatprep.mubr.f32.mxu1 %v7331_v33  ;;  %v8119_v58 = vand.u32 4294901760, %v7309_v17 }
 0x1fa   :  { %5802 = vmatmul.mubr.f32.gmra.mrb[20].mxu0 %v8093_v40  ;;  %5906 = vmatmul.mubr.f32.gmra.mrb[20].mxu1 %v7338_v23  ;;  %v8120_v40 = vand.u32 4294901760, %v7322_v39 }
 0x1fb   :  { %5804 = vmatprep.mubr.f32.mxu0 %v8094_v32  ;;  %5908 = vmatprep.mubr.f32.mxu1 %v7340_v7  ;;  %v8121_v32 = vand.u32 4294901760, %v7334_v37 }
 0x1fe   :  { %5805 = vmatmul.mubr.f32.gmra.mrb[22].mxu0 %v8095_v56  ;;  %5909 = vmatmul.mubr.f32.gmra.mrb[22].mxu1 %v7366_v50 }
 0x1ff   :  { %5807 = vmatprep.mubr.f32.mxu0 %v8096_v31  ;;  %5911 = vmatprep.mubr.f32.mxu1 %v7374_v24 }
 0x202   :  { %5808 = vmatmul.mubr.f32.gmra.mrb[24].mxu0 %v8097_v36  ;;  %5912 = vmatmul.mubr.f32.gmra.mrb[24].mxu1 %v7394_v11 }
 0x203   :  { %5810 = vmatprep.mubr.f32.mxu0 %v8098_v15  ;;  %5914 = vmatprep.mubr.f32.mxu1 %v7399_v12 }
 0x206   :  { %5811 = vmatmul.mubr.f32.gmra.mrb[26].mxu0 %v8099_v14  ;;  %5915 = vmatmul.mubr.f32.gmra.mrb[26].mxu1 %v7421_v61 }
 0x207   :  { %5813 = vmatprep.mubr.f32.mxu0 %v8100_v60  ;;  %5917 = vmatprep.mubr.f32.mxu1 %v7427_v25 }
 0x20a   :  { %5814 = vmatmul.mubr.f32.gmra.mrb[28].mxu0 %v8101_v28  ;;  %5918 = vmatmul.mubr.f32.gmra.mrb[28].mxu1 %v7442_v43 }
 0x20b   :  { %5816 = vmatprep.mubr.f32.mxu0 %v8102_v20  ;;  %5920 = vmatprep.mubr.f32.mxu1 %v7451_v16 }
 0x20e   :  { %5817 = vmatmul.mubr.f32.gmra.mrb[30].mxu0 %v8103_v52  ;;  %5921 = vmatmul.mubr.f32.gmra.mrb[30].mxu1 %v7460_v44 }
 0x20f   :  { %5821 = vmatprep.mubr.f32.mxu0 %v7023_v59  ;;  %5925 = vmatprep.mubr.f32.mxu1 %v7309_v17 }
 0x212   :  { %5822 = vmatmul.mubr.f32.vlgmr.msra.gmra.mrb[16].mxu0 %v7035_v22  ;;  %5926 = vmatmul.mubr.f32.vlgmr.msra.gmra.mrb[16].mxu1 %v7322_v39 }
 0x213   :  { %5950 = vmatpush3.msra.mxu1 %v7144_v13  ;;  %5824 = vmatprep.mubr.f32.mxu0 %v7042_v18 }
 0x214   :  { %5928 = vmatprep.mubr.f32.mxu1 %v7334_v37  ;;  %5846 = vmatpush3.msra.mxu0 %v6934_v53  ;;  %v8105_v53 = vld [vmem:[#allocation35_spill] sm:$0xff]  ;;  %v8130_v37 = vand.u32 4294901760, %v8113_v4 }
 0x215   :  { %5975 = vmatprep.subr.mxu1 %v7263_v54 }
 0x216   :  { %5825 = vmatmul.mubr.f32.gmra.mrb[18].mxu0 %v7057_v57  ;;  %5929 = vmatmul.mubr.f32.gmra.mrb[18].mxu1 %v7346_v46 }
 0x217   :  { %5827 = vmatprep.mubr.f32.mxu0 %v7064_v38  ;;  %5931 = vmatprep.mubr.f32.mxu1 %v7351_v26 }
 0x21a   :  { %5828 = vmatmul.mubr.f32.gmra.mrb[20].mxu0 %v7072_v27  ;;  %5932 = vmatmul.mubr.f32.gmra.mrb[20].mxu1 %v7361_v48 }
 0x21b   :  { %5830 = vmatprep.mubr.f32.mxu0 %v7074_v45  ;;  %5934 = vmatprep.mubr.f32.mxu1 %v7364_v62 }
 0x21e   :  { %5831 = vmatmul.mubr.f32.gmra.mrb[22].mxu0 %v8104_v47  ;;  %5935 = vmatmul.mubr.f32.gmra.mrb[22].mxu1 %v8105_v53 }
 0x21f   :  { %5833 = vmatprep.mubr.f32.mxu0 %v8106_v21  ;;  %5937 = vmatprep.mubr.f32.mxu1 %v8107_v63 }
 0x222   :  { %5834 = vmatmul.mubr.f32.gmra.mrb[24].mxu0 %v8108_v19  ;;  %5938 = vmatmul.mubr.f32.gmra.mrb[24].mxu1 %v8109_v41 }
 0x223   :  { %5836 = vmatprep.mubr.f32.mxu0 %v8110_v10  ;;  %5940 = vmatprep.mubr.f32.mxu1 %v8111_v55 }
 0x226   :  { %5837 = vmatmul.mubr.f32.gmra.mrb[26].mxu0 %v8112_v5  ;;  %5941 = vmatmul.mubr.f32.gmra.mrb[26].mxu1 %v8113_v4 }
 0x227   :  { %5839 = vmatprep.mubr.f32.mxu0 %v8114_v30  ;;  %5943 = vmatprep.mubr.f32.mxu1 %v8115_v0 }
 0x22a   :  { %5840 = vmatmul.mubr.f32.gmra.mrb[28].mxu0 %v8116_v35  ;;  %5944 = vmatmul.mubr.f32.gmra.mrb[28].mxu1 %v7458_v2 }
 0x22b   :  { %5842 = vmatprep.mubr.f32.mxu0 %v8117_v34  ;;  %5946 = vmatprep.mubr.f32.mxu1 %v7467_v49 }
 0x22e   :  { %5843 = vmatmul.mubr.f32.gmra.mrb[30].mxu0 %v8118_v29  ;;  %5947 = vmatmul.mubr.f32.gmra.mrb[30].mxu1 %v7476_v8 }
 0x22f   :  { %5847 = vmatprep.mubr.f32.mxu0 %v7023_v59  ;;  %5951 = vmatprep.mubr.f32.mxu1 %v8119_v58  ;;  %v8122_v59 = vand.u32 4294901760, %v7346_v46  ;;  %v8131_v46 = vand.u32 4294901760, %v8115_v0 }
 0x232   :  { %5848 = vmatmul.mubr.f32.vlgmr.msra.gmra.mrb[16].mxu0 %v7035_v22  ;;  %5952 = vmatmul.mubr.f32.vlgmr.msra.gmra.mrb[16].mxu1 %v8120_v40  ;;  %v8123_v22 = vand.u32 4294901760, %v7351_v26 }
 0x233   :  { %5976 = vmatpush3.msra.mxu1 %v7263_v54  ;;  %5850 = vmatprep.mubr.f32.mxu0 %v7042_v18  ;;  %v8124_v54 = vand.u32 4294901760, %v7361_v48  ;;  %v8125_v18 = vand.u32 4294901760, %v7364_v62  ;;  %v8132_v62 = vand.u32 4294901760, %v7458_v2 }
 0x234   :  { %5954 = vmatprep.mubr.f32.mxu1 %v8121_v32  ;;  %6001 = vmatprep.subr.mxu1 %v7144_v13 }
 0x236   :  { %5851 = vmatmul.mubr.f32.gmra.mrb[18].mxu0 %v7057_v57  ;;  %5955 = vmatmul.mubr.f32.gmra.mrb[18].mxu1 %v8122_v59  ;;  %v8126_v57 = vand.u32 4294901760, %v8105_v53 }
 0x237   :  { %5853 = vmatprep.mubr.f32.mxu0 %v7064_v38  ;;  %5957 = vmatprep.mubr.f32.mxu1 %v8123_v22  ;;  %v8127_v38 = vand.u32 4294901760, %v8107_v63 }
 0x23a   :  { %5854 = vmatmul.mubr.f32.gmra.mrb[20].mxu0 %v7072_v27  ;;  %5958 = vmatmul.mubr.f32.gmra.mrb[20].mxu1 %v8124_v54  ;;  %v8128_v27 = vand.u32 4294901760, %v8109_v41 }
 0x23b   :  { %5856 = vmatprep.mubr.f32.mxu0 %v7074_v45  ;;  %5960 = vmatprep.mubr.f32.mxu1 %v8125_v18  ;;  %v8129_v45 = vand.u32 4294901760, %v8111_v55 }
 0x23e   :  { %5857 = vmatmul.mubr.f32.gmra.mrb[22].mxu0 %v8104_v47  ;;  %5961 = vmatmul.mubr.f32.gmra.mrb[22].mxu1 %v8126_v57 }
 0x23f   :  { %5859 = vmatprep.mubr.f32.mxu0 %v8106_v21  ;;  %5963 = vmatprep.mubr.f32.mxu1 %v8127_v38 }
 0x242   :  { %5860 = vmatmul.mubr.f32.gmra.mrb[24].mxu0 %v8108_v19  ;;  %5964 = vmatmul.mubr.f32.gmra.mrb[24].mxu1 %v8128_v27 }
 0x243   :  { %5862 = vmatprep.mubr.f32.mxu0 %v8110_v10  ;;  %5966 = vmatprep.mubr.f32.mxu1 %v8129_v45 }
 0x245   :  { %v7624_v17 = vpop.f32.mrb[0].mxu0 }
 0x246   :  { %v7626_v39 = vpop.f32.mrb[1].mxu0  ;;  %5863 = vmatmul.mubr.f32.gmra.mrb[26].mxu0 %v8112_v5  ;;  %5967 = vmatmul.mubr.f32.gmra.mrb[26].mxu1 %v8130_v37 }
 0x247   :  { %5865 = vmatprep.mubr.f32.mxu0 %v8114_v30  ;;  %5969 = vmatprep.mubr.f32.mxu1 %v8131_v46 }
 0x249   :  { %v7634_v26 = vpop.f32.mrb[2].mxu0 }
 0x24a   :  { %v7636_v48 = vpop.f32.mrb[3].mxu0  ;;  %5866 = vmatmul.mubr.f32.gmra.mrb[28].mxu0 %v8116_v35  ;;  %5970 = vmatmul.mubr.f32.gmra.mrb[28].mxu1 %v8132_v62 }
 0x24b   :  { %5868 = vmatprep.mubr.f32.mxu0 %v8117_v34  ;;  %5972 = vmatprep.mubr.f32.mxu1 %v3973_v42 }
 0x24d   :  { %v7644_v56 = vpop.f32.mrb[4].mxu0 }
 0x24e   :  { %v7646_v31 = vpop.f32.mrb[5].mxu0  ;;  %5869 = vmatmul.mubr.f32.gmra.mrb[30].mxu0 %v8118_v29  ;;  %5973 = vmatmul.mubr.f32.gmra.mrb[30].mxu1 %v3983_v3 }
 0x24f   :  { %5977 = vmatprep.mubr.f32.mxu1 %v7294_v9 }
 0x251   :  { %v7652_v36 = vpop.f32.mrb[6].mxu0 }
 0x252   :  { %v7654_v2 = vpop.f32.mrb[7].mxu0  ;;  %5978 = vmatmul.mubr.f32.vlgmr.msra.gmra.mrb[16].mxu1 %v7306_v1 }
 0x253   :  { %6002 = vmatpush3.msra.mxu1 %v7144_v13  ;;  %5980 = vmatprep.mubr.f32.mxu1 %v7313_v51 }
 0x255   :  { %v7659_v49 = vpop.f32.mrb[8].mxu0 }
 0x256   :  { %v7661_v42 = vpop.f32.mrb[9].mxu0  ;;  %5981 = vmatmul.mubr.f32.gmra.mrb[18].mxu1 %v7324_v6 }
 0x257   :  { %5983 = vmatprep.mubr.f32.mxu1 %v7331_v33 }
 0x259   :  { %v7665_v8 = vpop.f32.mrb[10].mxu0 }
 0x25a   :  { %v7667_v3 = vpop.f32.mrb[11].mxu0  ;;  %5984 = vmatmul.mubr.f32.gmra.mrb[20].mxu1 %v7338_v23 }
 0x25b   :  { %5986 = vmatprep.mubr.f32.mxu1 %v7340_v7 }
 0x25d   :  { %v7671_v15 = vpop.f32.mrb[12].mxu0 }
 0x25e   :  { %v7673_v13 = vpop.f32.mrb[13].mxu0  ;;  %5987 = vmatmul.mubr.f32.gmra.mrb[22].mxu1 %v7366_v50 }
 0x25f   :  { %5989 = vmatprep.mubr.f32.mxu1 %v7374_v24 }
 0x261   :  { %v7677_v14 = vpop.f32.mrb[14].mxu0 }
 0x262   :  { %v7679_v60 = vpop.f32.mrb[15].mxu0  ;;  %5990 = vmatmul.mubr.f32.gmra.mrb[24].mxu1 %v7394_v11 }
 0x263   :  { %5992 = vmatprep.mubr.f32.mxu1 %v7399_v12 }
 0x266   :  { %5993 = vmatmul.mubr.f32.gmra.mrb[26].mxu1 %v7421_v61 }
 0x267   :  { %5995 = vmatprep.mubr.f32.mxu1 %v7427_v25 }
 0x26a   :  { %5996 = vmatmul.mubr.f32.gmra.mrb[28].mxu1 %v7442_v43 }
 0x26b   :  { %5998 = vmatprep.mubr.f32.mxu1 %v7451_v16 }
 0x26e   :  { %5999 = vmatmul.mubr.f32.gmra.mrb[30].mxu1 %v7460_v44 }
 0x26f   :  { %6003 = vmatprep.mubr.f32.mxu1 %v7294_v9 }
 0x272   :  { %6004 = vmatmul.mubr.f32.vlgmr.msra.gmra.mrb[16].mxu1 %v7306_v1 }
 0x273   :  { %6006 = vmatprep.mubr.f32.mxu1 %v7313_v51 }
 0x276   :  { %6007 = vmatmul.mubr.f32.gmra.mrb[18].mxu1 %v7324_v6 }
 0x277   :  { %6009 = vmatprep.mubr.f32.mxu1 %v7331_v33 }
 0x27a   :  { %6010 = vmatmul.mubr.f32.gmra.mrb[20].mxu1 %v7338_v23 }
 0x27b   :  { %6012 = vmatprep.mubr.f32.mxu1 %v7340_v7 }
 0x27e   :  { %6013 = vmatmul.mubr.f32.gmra.mrb[22].mxu1 %v7366_v50 }
 0x27f   :  { %6015 = vmatprep.mubr.f32.mxu1 %v7374_v24 }
 0x282   :  { %6016 = vmatmul.mubr.f32.gmra.mrb[24].mxu1 %v7394_v11 }
 0x283   :  { %6018 = vmatprep.mubr.f32.mxu1 %v7399_v12 }
 0x285   :  { %v5693_v9 = vpop.f32.mrb[0].mxu1 }
 0x286   :  { %v2420_v1 = vsub.f32 %v7624_v17, %v5693_v9  ;;  %v2325_v51 = vpop.f32.mrb[1].mxu1  ;;  %6019 = vmatmul.mubr.f32.gmra.mrb[26].mxu1 %v7421_v61 }
 0x287   :  { %v2419_v6 = vsub.f32 %v7626_v39, %v2325_v51  ;;  %6021 = vmatprep.mubr.f32.mxu1 %v7427_v25 }
 0x289   :  { %v7703_v33 = vpop.f32.mrb[2].mxu1 }
 0x28a   :  { %v2422_v23 = vsub.f32 %v7634_v26, %v7703_v33  ;;  %v7707_v24 = vpop.f32.mrb[3].mxu1  ;;  %6022 = vmatmul.mubr.f32.gmra.mrb[28].mxu1 %v7442_v43 }
 0x28b   :  { %6024 = vmatprep.mubr.f32.mxu1 %v7451_v16 }
 0x28d   :  { %v7713_v50 = vpop.f32.mrb[4].mxu1 }
 0x28e   :  { %v7717_v25 = vpop.f32.mrb[5].mxu1  ;;  %6025 = vmatmul.mubr.f32.gmra.mrb[30].mxu1 %v7460_v44 }
 0x291   :  { %v7722_v61 = vpop.f32.mrb[6].mxu1 }
 0x292   :  { %v7726_v28 = vpop.f32.mrb[7].mxu1 }
 0x295   :  { %v7730_v20 = vpop.f32.mrb[8].mxu1 }
 0x296   :  { %v7734_v47 = vpop.f32.mrb[9].mxu1 }
 0x299   :  { %v7738_v53 = vpop.f32.mrb[10].mxu1 }
 0x29a   :  { %v7742_v63 = vpop.f32.mrb[11].mxu1 }
 0x29d   :  { %v7746_v41 = vpop.f32.mrb[12].mxu1 }
 0x29e   :  { %v7750_v55 = vpop.f32.mrb[13].mxu1 }
 0x2a1   :  { %v7754_v4 = vpop.f32.mrb[14].mxu1 }
 0x2a2   :  { %v7758_v0 = vpop.f32.mrb[15].mxu1 }
 0x2a3   :  { %8133 = vst [vmem:[#allocation34_spill] sm:$0xff] %v7758_v0 }
 0x305   :  { %v5849_v34 = vpop.f32.mrb[16].mxu0 }
 0x306   :  { %v3588_v29 = vpop.f32.mrb[17].mxu0 }
 0x309   :  { %v5852_v58 = vpop.f32.mrb[18].mxu0 }
 0x30a   :  { %v3600_v40 = vpop.f32.mrb[19].mxu0 }
 0x30d   :  { %v5855_v32 = vpop.f32.mrb[20].mxu0 }
 0x30e   :  { %v3612_v59 = vpop.f32.mrb[21].mxu0 }
 0x311   :  { %v5858_v22 = vpop.f32.mrb[22].mxu0 }
 0x312   :  { %v3624_v54 = vpop.f32.mrb[23].mxu0 }
 0x315   :  { %v5861_v18 = vpop.f32.mrb[24].mxu0 }
 0x316   :  { %v3636_v57 = vpop.f32.mrb[25].mxu0 }
 0x319   :  { %v7762_v38 = vpop.f32.mrb[26].mxu0 }
 0x31a   :  { %v7764_v27 = vpop.f32.mrb[27].mxu0 }
 0x31d   :  { %v7766_v45 = vpop.f32.mrb[28].mxu0 }
 0x31e   :  { %v7768_v17 = vpop.f32.mrb[29].mxu0 }
 0x321   :  { %v7770_v39 = vpop.f32.mrb[30].mxu0 }
 0x322   :  { %v7772_v37 = vpop.f32.mrb[31].mxu0 }
 0x345   :  { %v6005_v46 = vpop.f32.mrb[16].mxu1 }
 0x346   :  { %v4857_v62 = vsub.f32 %v5849_v34, %v6005_v46  ;;  %v4762_v9 = vpop.f32.mrb[17].mxu1 }
 0x347   :  { %v4856_v51 = vsub.f32 %v3588_v29, %v4762_v9 }
 0x348   :  { %v4873_v35 = vmul.f32 0.125, %v4857_v62  ;;  %v8134_v62 = vsub.f32 %v7636_v48, %v7707_v24 }
 0x349   :  { %v4872_v30 = vmul.f32 0.125, %v4856_v51  ;;  %v6008_v5 = vpop.f32.mrb[18].mxu1 }
 0x34a   :  { %v4889_v10 = vsub.f32 %v2420_v1, %v4873_v35  ;;  %v4859_v19 = vsub.f32 %v5852_v58, %v6008_v5  ;;  %v4774_v21 = vpop.f32.mrb[19].mxu1  ;;  %v8137_v58 = vsub.f32 %v7652_v36, %v7722_v61 }
 0x34b   :  { %v4888_v44 = vsub.f32 %v2419_v6, %v4872_v30  ;;  %v4858_v52 = vsub.f32 %v3600_v40, %v4774_v21 }
 0x34c   :  { %v4937_v16 = vmul.f32 %v4889_v10, %v4889_v10  ;;  %v4875_v43 = vmul.f32 0.125, %v4859_v19 }
 0x34d   :  { %v4936_v11 = vmul.f32 %v4888_v44, %v4888_v44  ;;  %v4874_v12 = vmul.f32 0.125, %v4858_v52  ;;  %v6011_v7 = vpop.f32.mrb[20].mxu1  ;;  %v8135_v52 = vsub.f32 %v7644_v56, %v7713_v50 }
 0x34e   :  { %v4891_v0 = vsub.f32 %v2422_v23, %v4875_v43  ;;  %v4861_v34 = vsub.f32 %v5855_v32, %v6011_v7  ;;  %v4786_v46 = vpop.f32.mrb[21].mxu1  ;;  %v8136_v23 = vsub.f32 %v7646_v31, %v7717_v25 }
 0x34f   :  { %v4952_v29 = vadd.f32 %v4937_v16, %v4936_v11  ;;  %v4890_v1 = vsub.f32 %v8134_v62, %v4874_v12  ;;  %v4860_v5 = vsub.f32 %v3612_v59, %v4786_v46  ;;  %v8139_v46 = vsub.f32 %v7659_v49, %v7730_v20 }
 0x350   :  { %v4877_v35 = vmul.f32 0.125, %v4861_v34  ;;  %v4939_v26 = vmul.f32 %v4891_v0, %v4891_v0  ;;  %v8138_v0 = vsub.f32 %v7654_v2, %v7726_v28  ;;  %v8141_v49 = vsub.f32 %v7665_v8, %v7738_v53 }
 0x351   :  { %v4938_v6 = vmul.f32 %v4890_v1, %v4890_v1  ;;  %v4876_v21 = vmul.f32 0.125, %v4860_v5  ;;  %v6014_v10 = vpop.f32.mrb[22].mxu1  ;;  %v8140_v1 = vsub.f32 %v7661_v42, %v7734_v47  ;;  %v8142_v42 = vsub.f32 %v7667_v3, %v7742_v63 }
 0x352   :  { %v4893_v44 = vsub.f32 %v8135_v52, %v4877_v35  ;;  %v4863_v19 = vsub.f32 %v5858_v22, %v6014_v10  ;;  %v4798_v30 = vpop.f32.mrb[23].mxu1  ;;  %v8143_v8 = vsub.f32 %v7671_v15, %v7746_v41  ;;  %v8144_v3 = vsub.f32 %v7673_v13, %v7750_v55 }
 0x353   :  { %v4953_v33 = vadd.f32 %v4952_v29, %v4938_v6  ;;  %v4892_v7 = vsub.f32 %v8136_v23, %v4876_v21  ;;  %v4862_v11 = vsub.f32 %v3624_v54, %v4798_v30 }
 0x354   :  { %v4879_v48 = vmul.f32 0.125, %v4863_v19  ;;  %v4941_v32 = vmul.f32 %v4893_v44, %v4893_v44 }
 0x355   :  { %v4940_v24 = vmul.f32 %v4892_v7, %v4892_v7  ;;  %v4954_v12 = vadd.f32 %v4953_v33, %v4939_v26  ;;  %v4878_v43 = vmul.f32 0.125, %v4862_v11  ;;  %v6017_v16 = vpop.f32.mrb[24].mxu1 }
 0x356   :  { %v4895_v40 = vsub.f32 %v8137_v58, %v4879_v48  ;;  %v4865_v56 = vsub.f32 %v5861_v18, %v6017_v16  ;;  %v4810_v50 = vpop.f32.mrb[25].mxu1  ;;  %v8145_v58 = vsub.f32 %v7677_v14, %v7754_v4 }
 0x357   :  { %v4955_v59 = vadd.f32 %v4954_v12, %v4940_v24  ;;  %v4894_v22 = vsub.f32 %v8138_v0, %v4878_v43  ;;  %v4864_v31 = vsub.f32 %v3636_v57, %v4810_v50 }
 0x358   :  { %v4881_v25 = vmul.f32 0.125, %v4865_v56  ;;  %v4943_v18 = vmul.f32 %v4895_v40, %v4895_v40 }
 0x359   :  { %v4942_v54 = vmul.f32 %v4894_v22, %v4894_v22  ;;  %v4956_v9 = vadd.f32 %v4955_v59, %v4941_v32  ;;  %v4880_v51 = vmul.f32 0.125, %v4864_v31  ;;  %v6020_v34 = vpop.f32.mrb[26].mxu1 }
 0x35a   :  { %v4897_v29 = vsub.f32 %v8139_v46, %v4881_v25  ;;  %v4867_v36 = vsub.f32 %v7762_v38, %v6020_v34  ;;  %v4822_v61 = vpop.f32.mrb[27].mxu1 }
 0x35b   :  { %v4957_v62 = vadd.f32 %v4956_v9, %v4942_v54  ;;  %v4896_v2 = vsub.f32 %v8140_v1, %v4880_v51  ;;  %v4866_v28 = vsub.f32 %v7764_v27, %v4822_v61 }
 0x35c   :  { %v4883_v57 = vmul.f32 0.125, %v4867_v36  ;;  %v4945_v52 = vmul.f32 %v4897_v29, %v4897_v29 }
 0x35d   :  { %v4944_v5 = vmul.f32 %v4896_v2, %v4896_v2  ;;  %v4958_v35 = vadd.f32 %v4957_v62, %v4943_v18  ;;  %v4882_v6 = vmul.f32 0.125, %v4866_v28  ;;  %v6023_v21 = vpop.f32.mrb[28].mxu1 }
 0x35e   :  { %v4899_v20 = vsub.f32 %v8141_v49, %v4883_v57  ;;  %v4869_v38 = vsub.f32 %v7766_v45, %v6023_v21  ;;  %v4834_v10 = vpop.f32.mrb[29].mxu1 }
 0x35f   :  { %v4959_v44 = vadd.f32 %v4958_v35, %v4944_v5  ;;  %v4898_v47 = vsub.f32 %v8142_v42, %v4882_v6  ;;  %v4868_v27 = vsub.f32 %v7768_v17, %v4834_v10 }
 0x360   :  { %v4885_v19 = vmul.f32 0.125, %v4869_v38  ;;  %v4947_v11 = vmul.f32 %v4899_v20, %v4899_v20 }
 0x361   :  { %v4946_v30 = vmul.f32 %v4898_v47, %v4898_v47  ;;  %v4960_v26 = vadd.f32 %v4959_v44, %v4945_v52  ;;  %v4884_v33 = vmul.f32 0.125, %v4868_v27  ;;  %v6026_v23 = vpop.f32.mrb[30].mxu1 }
 0x362   :  { %v4901_v53 = vsub.f32 %v8143_v8, %v4885_v19  ;;  %v4871_v45 = vsub.f32 %v7770_v39, %v6026_v23  ;;  %v4846_v7 = vpop.f32.mrb[31].mxu1  ;;  %v8146_v39 = vld [vmem:[#allocation34_spill] sm:$0xff] }
 0x363   :  { %v4961_v48 = vadd.f32 %v4960_v26, %v4946_v30  ;;  %v4900_v63 = vsub.f32 %v8144_v3, %v4884_v33  ;;  %v4870_v17 = vsub.f32 %v7772_v37, %v4846_v7  ;;  %v8147_v56 = vsub.f32 %v7679_v60, %v8146_v39 }
 0x364   :  { %v4887_v24 = vmul.f32 0.125, %v4871_v45  ;;  %v4949_v41 = vmul.f32 %v4901_v53, %v4901_v53 }
 0x365   :  { %v4948_v12 = vmul.f32 %v4900_v63, %v4900_v63  ;;  %v4962_v43 = vadd.f32 %v4961_v48, %v4947_v11  ;;  %v4886_v16 = vmul.f32 0.125, %v4870_v17 }
 0x366   :  { %v4903_v15 = vsub.f32 %v8145_v58, %v4887_v24 }
 0x367   :  { %v4963_v40 = vadd.f32 %v4962_v43, %v4948_v12  ;;  %v4902_v50 = vsub.f32 %v8147_v56, %v4886_v16 }
 0x368   :  { %v4951_v13 = vmul.f32 %v4903_v15, %v4903_v15 }
 0x369   :  { %v4950_v32 = vmul.f32 %v4902_v50, %v4902_v50  ;;  %v4964_v59 = vadd.f32 %v4963_v40, %v4949_v41 }
 0x36b   :  { %v4965_v55 = vadd.f32 %v4964_v59, %v4950_v32 }
 0x36d   :  { %v4966_v0 = vadd.f32 %v4965_v55, %v4951_v13 }
 0x36f   :  { %4967 = vadd.xlane.f32.xlu0 %v4966_v0 }
 0x3fc   :  { %v4968_v37 = vpop.xlane.xlu0 %4967 }
 0x3fd   :  { %v4969_v22 = vrot.slane %v4968_v37, 4 }
 0x3ff   :  { %v4970_v31 = vadd.f32 %v4969_v22, %v4968_v37 }
 0x401   :  { %v4971_v25 = vrot.slane %v4970_v31, 2 }
 0x403   :  { %v4972_v54 = vadd.f32 %v4971_v25, %v4970_v31 }
 0x405   :  { %v4973_v9 = vrot.slane %v4972_v54, 1 }
 0x407   :  { %v4974_v14 = vadd.f32 %v4973_v9, %v4972_v54 }
 0x409   :  { %6347 = vpush %v4974_v14 }
 0x43a   :  { %s6348_s5 = spop %6347 }
 0x43b   :  { %v4976_v60 = vstv %s6348_s5 }
 0x43c   :  { %4978 = vst [vmem:[#allocation10] sm:$0xff] %v4976_v60 }
 0x43d   :  { %6408 = shalt.err (!%p6405_p6)
}
 0x43e   :  { %s6409_s9 = scalar_lea.hbm %s7836_s2, 128 }
 0x43f   :  { %p6410_p7 = scmp.ne.s32.totalorder %s7836_s2, %s6409_s9  ;;  %p6413_p8 = scmp.lt.u32.totalorder %s6409_s9, %s7836_s2 }
 0x441   :  { %p6415_p9 = pnand %p6413_p8, %p6410_p7 }
 0x443   :  { %6418 = shalt.err (!%p6415_p9)
}
 0x444   :  { %4988 = dma.vmem_to_hbm [thread:$0]  %s4986_s4, 128, %s7836_s2, [#allocation7]  }
 0x445   :  { %6423 = dma.done.wait [#allocation7], 128  }
 0x446   :  { %6424 = vsyncadd [#allocation7], 4294967168 }
 0x447   :  { %4992 = vsyncpa [#allocation6], 1 }
 0x448   :  { %4993 = vsyncpa [#allocation9], 1 }
 0x449   :  { %4994 = vsyncpa [#allocation7], 1 }

</bundles_post_ra>
